<compile_context>
chip_gen: v7x
topology: tpu7x:2x2x1
jax: 0.10.0
libtpu: 0.0.40
codegen_flags: <defaults>
</compile_context>

<pallas_src>
import functools

import jax
import jax.numpy as jnp
from jax.experimental import pallas as pl
from jax.experimental.pallas import tpu as pltpu

ENCODING_DIM_INPUT = 784
ENCODING_DIM_LAYER1 = 128
ENCODING_DIM_LAYER2 = 64
ENCODING_DIM_LAYER3 = 10
ENCODING_DIM_OUTPUT = 2

# (in, out) for each of the 8 Linear layers, in forward order.
LAYER_DIMS = [
    (ENCODING_DIM_INPUT, ENCODING_DIM_LAYER1),   # encoder
    (ENCODING_DIM_LAYER1, ENCODING_DIM_LAYER2),
    (ENCODING_DIM_LAYER2, ENCODING_DIM_LAYER3),
    (ENCODING_DIM_LAYER3, ENCODING_DIM_OUTPUT),
    (ENCODING_DIM_OUTPUT, ENCODING_DIM_LAYER3),  # decoder
    (ENCODING_DIM_LAYER3, ENCODING_DIM_LAYER2),
    (ENCODING_DIM_LAYER2, ENCODING_DIM_LAYER1),
    (ENCODING_DIM_LAYER1, ENCODING_DIM_INPUT),
]

_TOTAL_MACS = sum(fi * fo for fi, fo in LAYER_DIMS)


def _stack_ae_kernel(x_ref, *refs):
    # refs = (w1, b1, ..., w8, b8, enc_ref, dec_ref)
    param_refs = refs[:-2]
    enc_ref, dec_ref = refs[-2], refs[-1]

    def linear(h_bf16, idx):
        # bf16 x bf16 MXU matmul, f32 accumulation, f32 bias add.
        w = param_refs[2 * idx][...]              # (in, out) bf16
        b = param_refs[2 * idx + 1][...]          # (1, out)  f32
        return jnp.dot(h_bf16, w, preferred_element_type=jnp.float32) + b

    def relu_lo(y_f32):
        # ReLU in f32, downcast only as the next matmul operand.
        return jnp.maximum(y_f32, 0.0).astype(jnp.bfloat16)

    # (TM, 784) tile; cast in-kernel (VPU) instead of an extra HBM pass outside.
    h = x_ref[...].astype(jnp.bfloat16)

    # Encoder: 3x (Linear + ReLU), then Linear (no activation on the code layer).
    h = relu_lo(linear(h, 0))
    h = relu_lo(linear(h, 1))
    h = relu_lo(linear(h, 2))
    enc = linear(h, 3)                            # (TM, 2) f32
    enc_ref[...] = enc.astype(enc_ref.dtype)

    # Decoder: 3x (Linear + ReLU), then Linear + Tanh.
    h = relu_lo(linear(enc.astype(jnp.bfloat16), 4))
    h = relu_lo(linear(h, 5))
    h = relu_lo(linear(h, 6))
    dec = jnp.tanh(linear(h, 7))                  # f32 tanh on the EUP
    dec_ref[...] = dec.astype(dec_ref.dtype)


@functools.partial(jax.jit, static_argnames=("block_m", "out_dtype"))
def stack_autoencoder_forward(x, params, *, block_m=256, out_dtype=None):
    """Fused StackAutoEncoder forward.

    x:       (B, 784), any float dtype (f32 typical).
    params:  flat list [w1, b1, ..., w8, b8]; w_i (in, out) bf16, b_i (1, out) f32.
    Returns (encoded (B, 2), decoded (B, 784)), both in `out_dtype`
    (default: x.dtype, matching the PyTorch module).
    """
    if out_dtype is None:
        out_dtype = x.dtype
    B = x.shape[0]

    # Batch tile: multiple of 8 (sublane), no larger than the padded batch.
    tm = max(8, min(block_m, pl.cdiv(B, 8) * 8))
    tm = (tm // 8) * 8
    if B % tm != 0:
        x = jnp.pad(x, ((0, (-B) % tm), (0, 0)))
    b_pad = x.shape[0]
    grid = (b_pad // tm,)

    # x / enc / dec tiled over batch; weights & biases VMEM-resident (const map).
    x_spec = pl.BlockSpec((tm, ENCODING_DIM_INPUT), lambda i: (i, 0))
    enc_spec = pl.BlockSpec((tm, ENCODING_DIM_OUTPUT), lambda i: (i, 0))
    dec_spec = pl.BlockSpec((tm, ENCODING_DIM_INPUT), lambda i: (i, 0))
    param_specs = []
    for fi, fo in LAYER_DIMS:
        param_specs.append(pl.BlockSpec((fi, fo), lambda i: (0, 0)))  # weight
        param_specs.append(pl.BlockSpec((1, fo), lambda i: (0, 0)))   # bias

    param_bytes = sum(fi * fo * 2 + fo * 4 for fi, fo in LAYER_DIMS)
    x_bpe = jnp.dtype(x.dtype).itemsize
    o_bpe = jnp.dtype(out_dtype).itemsize
    cost = pl.CostEstimate(
        flops=2 * b_pad * _TOTAL_MACS,
        transcendentals=b_pad * ENCODING_DIM_INPUT,   # tanh on the last layer
        bytes_accessed=(b_pad * ENCODING_DIM_INPUT * x_bpe        # x in
                        + b_pad * ENCODING_DIM_INPUT * o_bpe      # dec out
                        + b_pad * ENCODING_DIM_OUTPUT * o_bpe     # enc out
                        + param_bytes),
    )

    enc, dec = pl.pallas_call(
        _stack_ae_kernel,
        grid=grid,
        in_specs=[x_spec] + param_specs,
        out_specs=(enc_spec, dec_spec),
        out_shape=(
            jax.ShapeDtypeStruct((b_pad, ENCODING_DIM_OUTPUT), out_dtype),
            jax.ShapeDtypeStruct((b_pad, ENCODING_DIM_INPUT), out_dtype),
        ),
        compiler_params=pltpu.CompilerParams(
            dimension_semantics=("parallel",)),
        cost_estimate=cost,
    )(x, *params)

    return enc[:B], dec[:B]


def init_params(key):
    """nn.Linear-style U(-1/sqrt(fan_in), +1/sqrt(fan_in)) init.
    Weights stored transposed as (in, out) bf16; biases (1, out) f32."""
    params = []
    for i, (fan_in, fan_out) in enumerate(LAYER_DIMS):
        kw, kb = jax.random.split(jax.random.fold_in(key, i))
        bound = 1.0 / jnp.sqrt(fan_in)
        w = jax.random.uniform(kw, (fan_in, fan_out), jnp.float32, -bound, bound)
        b = jax.random.uniform(kb, (1, fan_out), jnp.float32, -bound, bound)
        params.extend([w.astype(jnp.bfloat16), b])
    return params


def reference_forward(x, params):
    """Pure-JAX reference mirroring the kernel's bf16-operand / f32-accum math."""
    h = x.astype(jnp.bfloat16)
    for i in range(4):
        w, b = params[2 * i], params[2 * i + 1]
        h = jnp.dot(h, w, preferred_element_type=jnp.float32) + b
        if i < 3:
            h = jnp.maximum(h, 0.0).astype(jnp.bfloat16)
    enc = h                                              # (B, 2) f32
    h = enc.astype(jnp.bfloat16)
    for i in range(4, 8):
        w, b = params[2 * i], params[2 * i + 1]
        h = jnp.dot(h, w, preferred_element_type=jnp.float32) + b
        h = jnp.maximum(h, 0.0).astype(jnp.bfloat16) if i < 7 else jnp.tanh(h)
    return enc, h                                        # (B, 784) f32


if __name__ == "__main__":
    key = jax.random.PRNGKey(0)
    kx, kp = jax.random.split(key)

    B = 128                      # two batch tiles of 64 rows each
    x = jax.random.normal(kx, (B, ENCODING_DIM_INPUT), dtype=jnp.float32)
    params = init_params(kp)

    enc, dec = stack_autoencoder_forward(x, params, block_m=64)
    jax.block_until_ready((enc, dec))

    enc_ref, dec_ref = reference_forward(x, params)
    assert enc.shape == (B, ENCODING_DIM_OUTPUT)
    assert dec.shape == (B, ENCODING_DIM_INPUT)
    assert enc.dtype == x.dtype and dec.dtype == x.dtype
    assert jnp.allclose(enc, enc_ref, atol=1e-2, rtol=1e-2), "encoder mismatch"
    assert jnp.allclose(dec, dec_ref, atol=2e-2, rtol=2e-2), "decoder mismatch"

    print("KERNEL_OK")
</pallas_src>

<mosaic_0001>
module attributes {stable_mosaic.version = 11 : i64} {
  func.func @_stack_ae_kernel(%arg0: i32, %arg1: memref<64x784xf32, #tpu.memory_space<vmem>>, %arg2: memref<784x128xbf16, #tpu.memory_space<vmem>>, %arg3: memref<1x128xf32, #tpu.memory_space<vmem>>, %arg4: memref<128x64xbf16, #tpu.memory_space<vmem>>, %arg5: memref<1x64xf32, #tpu.memory_space<vmem>>, %arg6: memref<64x10xbf16, #tpu.memory_space<vmem>>, %arg7: memref<1x10xf32, #tpu.memory_space<vmem>>, %arg8: memref<10x2xbf16, #tpu.memory_space<vmem>>, %arg9: memref<1x2xf32, #tpu.memory_space<vmem>>, %arg10: memref<2x10xbf16, #tpu.memory_space<vmem>>, %arg11: memref<1x10xf32, #tpu.memory_space<vmem>>, %arg12: memref<10x64xbf16, #tpu.memory_space<vmem>>, %arg13: memref<1x64xf32, #tpu.memory_space<vmem>>, %arg14: memref<64x128xbf16, #tpu.memory_space<vmem>>, %arg15: memref<1x128xf32, #tpu.memory_space<vmem>>, %arg16: memref<128x784xbf16, #tpu.memory_space<vmem>>, %arg17: memref<1x784xf32, #tpu.memory_space<vmem>>, %arg18: memref<64x2xf32, #tpu.memory_space<vmem>>, %arg19: memref<64x784xf32, #tpu.memory_space<vmem>>) attributes {dimension_semantics = [#tpu.dimension_semantics<parallel>], iteration_bounds = array<i64: 2>, scalar_prefetch = 0 : i64, scratch_operands = 0 : i64, tpu.core_type = #tpu.core_type<tc>, window_params = [{transform_indices = @transform_0, window_bounds = array<i64: 64, 784>}, {pipeline_mode = #tpu.pipeline_mode<synchronous>, transform_indices = @transform_1, window_bounds = array<i64: 784, 128>}, {pipeline_mode = #tpu.pipeline_mode<synchronous>, transform_indices = @transform_2, window_bounds = array<i64: 1, 128>}, {pipeline_mode = #tpu.pipeline_mode<synchronous>, transform_indices = @transform_3, window_bounds = array<i64: 128, 64>}, {pipeline_mode = #tpu.pipeline_mode<synchronous>, transform_indices = @transform_4, window_bounds = array<i64: 1, 64>}, {pipeline_mode = #tpu.pipeline_mode<synchronous>, transform_indices = @transform_5, window_bounds = array<i64: 64, 10>}, {pipeline_mode = #tpu.pipeline_mode<synchronous>, transform_indices = @transform_6, window_bounds = array<i64: 1, 10>}, {pipeline_mode = #tpu.pipeline_mode<synchronous>, transform_indices = @transform_7, window_bounds = array<i64: 10, 2>}, {pipeline_mode = #tpu.pipeline_mode<synchronous>, transform_indices = @transform_8, window_bounds = array<i64: 1, 2>}, {pipeline_mode = #tpu.pipeline_mode<synchronous>, transform_indices = @transform_9, window_bounds = array<i64: 2, 10>}, {pipeline_mode = #tpu.pipeline_mode<synchronous>, transform_indices = @transform_10, window_bounds = array<i64: 1, 10>}, {pipeline_mode = #tpu.pipeline_mode<synchronous>, transform_indices = @transform_11, window_bounds = array<i64: 10, 64>}, {pipeline_mode = #tpu.pipeline_mode<synchronous>, transform_indices = @transform_12, window_bounds = array<i64: 1, 64>}, {pipeline_mode = #tpu.pipeline_mode<synchronous>, transform_indices = @transform_13, window_bounds = array<i64: 64, 128>}, {pipeline_mode = #tpu.pipeline_mode<synchronous>, transform_indices = @transform_14, window_bounds = array<i64: 1, 128>}, {pipeline_mode = #tpu.pipeline_mode<synchronous>, transform_indices = @transform_15, window_bounds = array<i64: 128, 784>}, {pipeline_mode = #tpu.pipeline_mode<synchronous>, transform_indices = @transform_16, window_bounds = array<i64: 1, 784>}, {transform_indices = @transform_17, window_bounds = array<i64: 64, 2>}, {transform_indices = @transform_18, window_bounds = array<i64: 64, 784>}]} {
    %c0 = arith.constant 0 : index
    %c0_0 = arith.constant 0 : index
    %0 = vector.load %arg1[%c0, %c0_0] : memref<64x784xf32, #tpu.memory_space<vmem>>, vector<64x784xf32>
    %1 = arith.truncf %0 : vector<64x784xf32> to vector<64x784xbf16>
    %c0_1 = arith.constant 0 : index
    %c0_2 = arith.constant 0 : index
    %2 = vector.load %arg2[%c0_1, %c0_2] : memref<784x128xbf16, #tpu.memory_space<vmem>>, vector<784x128xbf16>
    %c0_3 = arith.constant 0 : index
    %c0_4 = arith.constant 0 : index
    %3 = vector.load %arg3[%c0_3, %c0_4] : memref<1x128xf32, #tpu.memory_space<vmem>>, vector<1x128xf32>
    %cst = arith.constant dense<0.000000e+00> : vector<64x128xf32>
    %4 = tpu.matmul %1, %2, %cst {dimension_numbers = #tpu.dot_dimension_numbers<[1], [0], [0], [1], [0, 0, 1, 1], [], []>} : vector<64x784xbf16>, vector<784x128xbf16>, vector<64x128xf32> -> vector<64x128xf32>
    %5 = vector.broadcast %3 : vector<1x128xf32> to vector<64x128xf32>
    %6 = arith.addf %4, %5 : vector<64x128xf32>
    %cst_5 = arith.constant 0.000000e+00 : f32
    %7 = vector.broadcast %cst_5 : f32 to vector<64x128xf32>
    %8 = arith.maximumf %6, %7 : vector<64x128xf32>
    %9 = arith.truncf %8 : vector<64x128xf32> to vector<64x128xbf16>
    %c0_6 = arith.constant 0 : index
    %c0_7 = arith.constant 0 : index
    %10 = vector.load %arg4[%c0_6, %c0_7] : memref<128x64xbf16, #tpu.memory_space<vmem>>, vector<128x64xbf16>
    %c0_8 = arith.constant 0 : index
    %c0_9 = arith.constant 0 : index
    %11 = vector.load %arg5[%c0_8, %c0_9] : memref<1x64xf32, #tpu.memory_space<vmem>>, vector<1x64xf32>
    %cst_10 = arith.constant dense<0.000000e+00> : vector<64x64xf32>
    %12 = tpu.matmul %9, %10, %cst_10 {dimension_numbers = #tpu.dot_dimension_numbers<[1], [0], [0], [1], [0, 0, 1, 1], [], []>} : vector<64x128xbf16>, vector<128x64xbf16>, vector<64x64xf32> -> vector<64x64xf32>
    %13 = vector.broadcast %11 : vector<1x64xf32> to vector<64x64xf32>
    %14 = arith.addf %12, %13 : vector<64x64xf32>
    %cst_11 = arith.constant 0.000000e+00 : f32
    %15 = vector.broadcast %cst_11 : f32 to vector<64x64xf32>
    %16 = arith.maximumf %14, %15 : vector<64x64xf32>
    %17 = arith.truncf %16 : vector<64x64xf32> to vector<64x64xbf16>
    %c0_12 = arith.constant 0 : index
    %c0_13 = arith.constant 0 : index
    %18 = vector.load %arg6[%c0_12, %c0_13] : memref<64x10xbf16, #tpu.memory_space<vmem>>, vector<64x10xbf16>
    %c0_14 = arith.constant 0 : index
    %c0_15 = arith.constant 0 : index
    %19 = vector.load %arg7[%c0_14, %c0_15] : memref<1x10xf32, #tpu.memory_space<vmem>>, vector<1x10xf32>
    %cst_16 = arith.constant dense<0.000000e+00> : vector<64x10xf32>
    %20 = tpu.matmul %17, %18, %cst_16 {dimension_numbers = #tpu.dot_dimension_numbers<[1], [0], [0], [1], [0, 0, 1, 1], [], []>} : vector<64x64xbf16>, vector<64x10xbf16>, vector<64x10xf32> -> vector<64x10xf32>
    %21 = vector.broadcast %19 : vector<1x10xf32> to vector<64x10xf32>
    %22 = arith.addf %20, %21 : vector<64x10xf32>
    %cst_17 = arith.constant 0.000000e+00 : f32
    %23 = vector.broadcast %cst_17 : f32 to vector<64x10xf32>
    %24 = arith.maximumf %22, %23 : vector<64x10xf32>
    %25 = arith.truncf %24 : vector<64x10xf32> to vector<64x10xbf16>
    %c0_18 = arith.constant 0 : index
    %c0_19 = arith.constant 0 : index
    %26 = vector.load %arg8[%c0_18, %c0_19] : memref<10x2xbf16, #tpu.memory_space<vmem>>, vector<10x2xbf16>
    %c0_20 = arith.constant 0 : index
    %c0_21 = arith.constant 0 : index
    %27 = vector.load %arg9[%c0_20, %c0_21] : memref<1x2xf32, #tpu.memory_space<vmem>>, vector<1x2xf32>
    %cst_22 = arith.constant dense<0.000000e+00> : vector<64x2xf32>
    %28 = tpu.matmul %25, %26, %cst_22 {dimension_numbers = #tpu.dot_dimension_numbers<[1], [0], [0], [1], [0, 0, 1, 1], [], []>} : vector<64x10xbf16>, vector<10x2xbf16>, vector<64x2xf32> -> vector<64x2xf32>
    %29 = vector.broadcast %27 : vector<1x2xf32> to vector<64x2xf32>
    %30 = arith.addf %28, %29 : vector<64x2xf32>
    %c0_23 = arith.constant 0 : index
    %c0_24 = arith.constant 0 : index
    %31 = vector.load %arg18[%c0_23, %c0_24] : memref<64x2xf32, #tpu.memory_space<vmem>>, vector<64x2xf32>
    tpu.vector_store %arg18[%c0_23, %c0_24], %30 {strides = array<i32>} : memref<64x2xf32, #tpu.memory_space<vmem>>, vector<64x2xf32>,
    %32 = arith.truncf %30 : vector<64x2xf32> to vector<64x2xbf16>
    %c0_25 = arith.constant 0 : index
    %c0_26 = arith.constant 0 : index
    %33 = vector.load %arg10[%c0_25, %c0_26] : memref<2x10xbf16, #tpu.memory_space<vmem>>, vector<2x10xbf16>
    %c0_27 = arith.constant 0 : index
    %c0_28 = arith.constant 0 : index
    %34 = vector.load %arg11[%c0_27, %c0_28] : memref<1x10xf32, #tpu.memory_space<vmem>>, vector<1x10xf32>
    %cst_29 = arith.constant dense<0.000000e+00> : vector<64x10xf32>
    %35 = tpu.matmul %32, %33, %cst_29 {dimension_numbers = #tpu.dot_dimension_numbers<[1], [0], [0], [1], [0, 0, 1, 1], [], []>} : vector<64x2xbf16>, vector<2x10xbf16>, vector<64x10xf32> -> vector<64x10xf32>
    %36 = vector.broadcast %34 : vector<1x10xf32> to vector<64x10xf32>
    %37 = arith.addf %35, %36 : vector<64x10xf32>
    %cst_30 = arith.constant 0.000000e+00 : f32
    %38 = vector.broadcast %cst_30 : f32 to vector<64x10xf32>
    %39 = arith.maximumf %37, %38 : vector<64x10xf32>
    %40 = arith.truncf %39 : vector<64x10xf32> to vector<64x10xbf16>
    %c0_31 = arith.constant 0 : index
    %c0_32 = arith.constant 0 : index
    %41 = vector.load %arg12[%c0_31, %c0_32] : memref<10x64xbf16, #tpu.memory_space<vmem>>, vector<10x64xbf16>
    %c0_33 = arith.constant 0 : index
    %c0_34 = arith.constant 0 : index
    %42 = vector.load %arg13[%c0_33, %c0_34] : memref<1x64xf32, #tpu.memory_space<vmem>>, vector<1x64xf32>
    %cst_35 = arith.constant dense<0.000000e+00> : vector<64x64xf32>
    %43 = tpu.matmul %40, %41, %cst_35 {dimension_numbers = #tpu.dot_dimension_numbers<[1], [0], [0], [1], [0, 0, 1, 1], [], []>} : vector<64x10xbf16>, vector<10x64xbf16>, vector<64x64xf32> -> vector<64x64xf32>
    %44 = vector.broadcast %42 : vector<1x64xf32> to vector<64x64xf32>
    %45 = arith.addf %43, %44 : vector<64x64xf32>
    %cst_36 = arith.constant 0.000000e+00 : f32
    %46 = vector.broadcast %cst_36 : f32 to vector<64x64xf32>
    %47 = arith.maximumf %45, %46 : vector<64x64xf32>
    %48 = arith.truncf %47 : vector<64x64xf32> to vector<64x64xbf16>
    %c0_37 = arith.constant 0 : index
    %c0_38 = arith.constant 0 : index
    %49 = vector.load %arg14[%c0_37, %c0_38] : memref<64x128xbf16, #tpu.memory_space<vmem>>, vector<64x128xbf16>
    %c0_39 = arith.constant 0 : index
    %c0_40 = arith.constant 0 : index
    %50 = vector.load %arg15[%c0_39, %c0_40] : memref<1x128xf32, #tpu.memory_space<vmem>>, vector<1x128xf32>
    %cst_41 = arith.constant dense<0.000000e+00> : vector<64x128xf32>
    %51 = tpu.matmul %48, %49, %cst_41 {dimension_numbers = #tpu.dot_dimension_numbers<[1], [0], [0], [1], [0, 0, 1, 1], [], []>} : vector<64x64xbf16>, vector<64x128xbf16>, vector<64x128xf32> -> vector<64x128xf32>
    %52 = vector.broadcast %50 : vector<1x128xf32> to vector<64x128xf32>
    %53 = arith.addf %51, %52 : vector<64x128xf32>
    %cst_42 = arith.constant 0.000000e+00 : f32
    %54 = vector.broadcast %cst_42 : f32 to vector<64x128xf32>
    %55 = arith.maximumf %53, %54 : vector<64x128xf32>
    %56 = arith.truncf %55 : vector<64x128xf32> to vector<64x128xbf16>
    %c0_43 = arith.constant 0 : index
    %c0_44 = arith.constant 0 : index
    %57 = vector.load %arg16[%c0_43, %c0_44] : memref<128x784xbf16, #tpu.memory_space<vmem>>, vector<128x784xbf16>
    %c0_45 = arith.constant 0 : index
    %c0_46 = arith.constant 0 : index
    %58 = vector.load %arg17[%c0_45, %c0_46] : memref<1x784xf32, #tpu.memory_space<vmem>>, vector<1x784xf32>
    %cst_47 = arith.constant dense<0.000000e+00> : vector<64x784xf32>
    %59 = tpu.matmul %56, %57, %cst_47 {dimension_numbers = #tpu.dot_dimension_numbers<[1], [0], [0], [1], [0, 0, 1, 1], [], []>} : vector<64x128xbf16>, vector<128x784xbf16>, vector<64x784xf32> -> vector<64x784xf32>
    %60 = vector.broadcast %58 : vector<1x784xf32> to vector<64x784xf32>
    %61 = arith.addf %59, %60 : vector<64x784xf32>
    %62 = math.tanh %61 : vector<64x784xf32>
    %c0_48 = arith.constant 0 : index
    %c0_49 = arith.constant 0 : index
    %63 = vector.load %arg19[%c0_48, %c0_49] : memref<64x784xf32, #tpu.memory_space<vmem>>, vector<64x784xf32>
    tpu.vector_store %arg19[%c0_48, %c0_49], %62 {strides = array<i32>} : memref<64x784xf32, #tpu.memory_space<vmem>>, vector<64x784xf32>,
    return
  }
  func.func @transform_0(%arg0: i32) -> (i32, i32) {
    %c0_i32 = arith.constant 0 : i32
    %c0_i32_0 = arith.constant 0 : i32
    return %arg0, %c0_i32 : i32, i32
  }
  func.func @transform_1(%arg0: i32) -> (i32, i32) {
    %c0_i32 = arith.constant 0 : i32
    %c0_i32_0 = arith.constant 0 : i32
    %c0_i32_1 = arith.constant 0 : i32
    return %c0_i32, %c0_i32_0 : i32, i32
  }
  func.func @transform_2(%arg0: i32) -> (i32, i32) {
    %c0_i32 = arith.constant 0 : i32
    %c0_i32_0 = arith.constant 0 : i32
    %c0_i32_1 = arith.constant 0 : i32
    return %c0_i32, %c0_i32_0 : i32, i32
  }
  func.func @transform_3(%arg0: i32) -> (i32, i32) {
    %c0_i32 = arith.constant 0 : i32
    %c0_i32_0 = arith.constant 0 : i32
    %c0_i32_1 = arith.constant 0 : i32
    return %c0_i32, %c0_i32_0 : i32, i32
  }
  func.func @transform_4(%arg0: i32) -> (i32, i32) {
    %c0_i32 = arith.constant 0 : i32
    %c0_i32_0 = arith.constant 0 : i32
    %c0_i32_1 = arith.constant 0 : i32
    return %c0_i32, %c0_i32_0 : i32, i32
  }
  func.func @transform_5(%arg0: i32) -> (i32, i32) {
    %c0_i32 = arith.constant 0 : i32
    %c0_i32_0 = arith.constant 0 : i32
    %c0_i32_1 = arith.constant 0 : i32
    return %c0_i32, %c0_i32_0 : i32, i32
  }
  func.func @transform_6(%arg0: i32) -> (i32, i32) {
    %c0_i32 = arith.constant 0 : i32
    %c0_i32_0 = arith.constant 0 : i32
    %c0_i32_1 = arith.constant 0 : i32
    return %c0_i32, %c0_i32_0 : i32, i32
  }
  func.func @transform_7(%arg0: i32) -> (i32, i32) {
    %c0_i32 = arith.constant 0 : i32
    %c0_i32_0 = arith.constant 0 : i32
    %c0_i32_1 = arith.constant 0 : i32
    return %c0_i32, %c0_i32_0 : i32, i32
  }
  func.func @transform_8(%arg0: i32) -> (i32, i32) {
    %c0_i32 = arith.constant 0 : i32
    %c0_i32_0 = arith.constant 0 : i32
    %c0_i32_1 = arith.constant 0 : i32
    return %c0_i32, %c0_i32_0 : i32, i32
  }
  func.func @transform_9(%arg0: i32) -> (i32, i32) {
    %c0_i32 = arith.constant 0 : i32
    %c0_i32_0 = arith.constant 0 : i32
    %c0_i32_1 = arith.constant 0 : i32
    return %c0_i32, %c0_i32_0 : i32, i32
  }
  func.func @transform_10(%arg0: i32) -> (i32, i32) {
    %c0_i32 = arith.constant 0 : i32
    %c0_i32_0 = arith.constant 0 : i32
    %c0_i32_1 = arith.constant 0 : i32
    return %c0_i32, %c0_i32_0 : i32, i32
  }
  func.func @transform_11(%arg0: i32) -> (i32, i32) {
    %c0_i32 = arith.constant 0 : i32
    %c0_i32_0 = arith.constant 0 : i32
    %c0_i32_1 = arith.constant 0 : i32
    return %c0_i32, %c0_i32_0 : i32, i32
  }
  func.func @transform_12(%arg0: i32) -> (i32, i32) {
    %c0_i32 = arith.constant 0 : i32
    %c0_i32_0 = arith.constant 0 : i32
    %c0_i32_1 = arith.constant 0 : i32
    return %c0_i32, %c0_i32_0 : i32, i32
  }
  func.func @transform_13(%arg0: i32) -> (i32, i32) {
    %c0_i32 = arith.constant 0 : i32
    %c0_i32_0 = arith.constant 0 : i32
    %c0_i32_1 = arith.constant 0 : i32
    return %c0_i32, %c0_i32_0 : i32, i32
  }
  func.func @transform_14(%arg0: i32) -> (i32, i32) {
    %c0_i32 = arith.constant 0 : i32
    %c0_i32_0 = arith.constant 0 : i32
    %c0_i32_1 = arith.constant 0 : i32
    return %c0_i32, %c0_i32_0 : i32, i32
  }
  func.func @transform_15(%arg0: i32) -> (i32, i32) {
    %c0_i32 = arith.constant 0 : i32
    %c0_i32_0 = arith.constant 0 : i32
    %c0_i32_1 = arith.constant 0 : i32
    return %c0_i32, %c0_i32_0 : i32, i32
  }
  func.func @transform_16(%arg0: i32) -> (i32, i32) {
    %c0_i32 = arith.constant 0 : i32
    %c0_i32_0 = arith.constant 0 : i32
    %c0_i32_1 = arith.constant 0 : i32
    return %c0_i32, %c0_i32_0 : i32, i32
  }
  func.func @transform_17(%arg0: i32) -> (i32, i32) {
    %c0_i32 = arith.constant 0 : i32
    %c0_i32_0 = arith.constant 0 : i32
    return %arg0, %c0_i32 : i32, i32
  }
  func.func @transform_18(%arg0: i32) -> (i32, i32) {
    %c0_i32 = arith.constant 0 : i32
    %c0_i32_0 = arith.constant 0 : i32
    return %arg0, %c0_i32 : i32, i32
  }
}

</mosaic_0001>

<bundles_post_ra>
// kernel: stack_autoencoder_forward.1
= control target key start
LH: loop header
LB: loop body
LE: loop exit
PB: predicated region body
PF: predicated region fallthrough
CT: control target
= control target key end

     0   :  { %s3808_s27 = smov 0   ;;  %s4506_s0 = inlined_call_operand.vmem [shape: f32[128,784], index: 0, kind: input, shape index: {}]   ;;  %s4507_s1 = inlined_call_operand.vmem [shape: bf16[784,128], index: 1, kind: input, shape index: {}]   ;;  %s4508_s2 = inlined_call_operand.vmem [shape: f32[1,128], index: 2, kind: input, shape index: {}]   ;;  %s4509_s3 = inlined_call_operand.vmem [shape: bf16[128,64], index: 3, kind: input, shape index: {}]   ;;  %s4510_s4 = inlined_call_operand.vmem [shape: f32[1,64], index: 4, kind: input, shape index: {}]   ;;  %s4511_s5 = inlined_call_operand.vmem [shape: bf16[64,10], index: 5, kind: input, shape index: {}]   ;;  %s4512_s6 = inlined_call_operand.vmem [shape: f32[1,10], index: 6, kind: input, shape index: {}]   ;;  %s4513_s7 = inlined_call_operand.vmem [shape: bf16[10,2], index: 7, kind: input, shape index: {}]   ;;  %s4514_s8 = inlined_call_operand.vmem [shape: f32[1,2], index: 8, kind: input, shape index: {}]   ;;  %s4515_s9 = inlined_call_operand.vmem [shape: bf16[2,10], index: 9, kind: input, shape index: {}]   ;;  %s4516_s10 = inlined_call_operand.vmem [shape: f32[1,10], index: 10, kind: input, shape index: {}]   ;;  %s4517_s11 = inlined_call_operand.vmem [shape: bf16[10,64], index: 11, kind: input, shape index: {}]   ;;  %s4518_s12 = inlined_call_operand.vmem [shape: f32[1,64], index: 12, kind: input, shape index: {}]   ;;  %s4519_s13 = inlined_call_operand.vmem [shape: bf16[64,128], index: 13, kind: input, shape index: {}]   ;;  %s4520_s14 = inlined_call_operand.vmem [shape: f32[1,128], index: 14, kind: input, shape index: {}]   ;;  %s4521_s15 = inlined_call_operand.vmem [shape: bf16[128,784], index: 15, kind: input, shape index: {}]   ;;  %s4522_s16 = inlined_call_operand.vmem [shape: f32[1,784], index: 16, kind: input, shape index: {}]   ;;  %s4523_s17 = inlined_call_operand.vmem [shape: f32[128,2], index: 17, kind: output, shape index: {0}]   ;;  %s4524_s18 = inlined_call_operand.vmem [shape: f32[128,784], index: 18, kind: output, shape index: {1}]  }
   0x1   :  { %4526 = sst [smem:[#allocation2_spill]] %s4506_s0 }
   0x2   :  { %4527 = sst [smem:[#allocation3_spill]] %s4507_s1 }
   0x3   :  { %4528 = sst [smem:[#allocation4_spill]] %s4508_s2 }
   0x4 LB: > { %s2965_s28 = sadd.s32 4294967295, %s3710_s27   ;;  %p2969_p0 = scmp.ge.s32.totalorder %s3710_s27, 1  ;;  %s3710_s27 = sphi %s3808_s27, %s29_s27  }
   0x5   : > { %p517_p1 = scmp.lt.s32.totalorder %s3710_s27, 3 }
   0x7   : > { %p518_p2 = pnand %p2969_p0, %p517_p1 }
   0x8   : > { %s4529_s0 = sld [smem:[#allocation3_spill]] (!%p518_p2)  ;;  %s2970_s20 = sshll.u32 (!%p518_p2), %s2965_s28, 3  ;;  %vm1082_vm0 = vcmask (!%p518_p2), 130048   ;;  %vm1671_vm1 = vcmask (!%p518_p2), 1044480   ;;  %vm1554_vm2 = vcmask (!%p518_p2), 523264   ;;  %vm1773_vm3 = vcmask (!%p518_p2), 1040384  }
   0x9   : > { %521 = sbr.rel (%p518_p2) target bundleno = 1926 (0x786), region = 88  ;;  %p579_p3 = scmp.lt.s32.totalorder (!%p518_p2), %s2970_s20, 15  ;;  %vm1658_vm4 = vcmask (!%p518_p2), 80896   ;;  %vm1740_vm5 = vcmask (!%p518_p2), 15360  }
   0xa   : > { %s4530_s30 = sld [smem:[#allocation2_spill]] (!%p518_p2)  ;;  %s4531_s21 = sld [smem:[#allocation4_spill]] (!%p518_p2) }
   0xe   : > { %v3445_v0 = vld [vmem:[%s4529_s0 + $0x40] sm:$0xff] (!%p518_p2)   ;;  %v3449_v4 = vld [vmem:[%s4529_s0 + $0x48] sm:$0xff] (!%p518_p2)   ;;  %v3453_v8 = vld [vmem:[%s4529_s0 + $0x50] sm:$0xff] (!%p518_p2)  }
   0xf   : > { %v3446_v1 = vld [vmem:[%s4529_s0] sm:$0xff] (!%p518_p2)   ;;  %3132 = vmatprep.subr.bf16.mxu0 (!%p518_p2), %v3445_v0  ;;  %v3450_v5 = vld [vmem:[%s4529_s0 + $0x8] sm:$0xff] (!%p518_p2)   ;;  %v3454_v9 = vld [vmem:[%s4529_s0 + $0x10] sm:$0xff] (!%p518_p2)  }
  0x10   : > { %v3447_v2 = vld [vmem:[%s4529_s0 + $0xc0] sm:$0xff]   ;;  %3133 = vmatpush3.bf16.msra.mxu0 %v3446_v1  ;;  %v3451_v6 = vld [vmem:[%s4529_s0 + $0xc8] sm:$0xff]   ;;  %v3455_v10 = vld [vmem:[%s4529_s0 + $0xd0] sm:$0xff]   ;;  %s4533_s20 = smov (!%p579_p3, %s2970_s20), 15 }
  0x11   : > { %v3448_v3 = vld [vmem:[%s4529_s0 + $0x80] sm:$0xff]   ;;  %3172 = vmatprep.subr.bf16.mxu1 %v3447_v2  ;;  %3134 = vmatprep.subr.bf16.mxu0 %v3449_v4  ;;  %v3452_v7 = vld [vmem:[%s4529_s0 + $0x88] sm:$0xff]   ;;  %v3456_v11 = vld [vmem:[%s4529_s0 + $0x90] sm:$0xff]   ;;  %s3435_s19 = smul.u32 56, %s4533_s20  ;;  %s2973_s24 = sshll.u32 %s4533_s20, 3 }
  0x12   : > { %3173 = vmatpush3.bf16.msra.mxu1 %v3448_v3  ;;  %v3457_v12 = vld [vmem:[%s4529_s0 + $0x58] sm:$0xff]   ;;  %v3461_v16 = vld [vmem:[%s4529_s0 + $0x60] sm:$0xff]   ;;  %v3465_v20 = vld [vmem:[%s4529_s0 + $0x68] sm:$0xff]   ;;  %s589_s28 = scalar_lea.vmem %s4523_s17, %s2973_s24 }
  0x13   : > { %3174 = vmatprep.subr.bf16.mxu1 %v3451_v6  ;;  %v3458_v13 = vld [vmem:[%s4529_s0 + $0x18] sm:$0xff]   ;;  %v3462_v17 = vld [vmem:[%s4529_s0 + $0x20] sm:$0xff]   ;;  %v3466_v21 = vld [vmem:[%s4529_s0 + $0x28] sm:$0xff]   ;;  %s3913_s1 = scalar_lea.vmem %s4530_s30, %s3435_s19  ;;  %s4381_s29 = scalar_lea.vmem %s4524_s18, %s3435_s19 }
  0x14   : > { %3135 = vmatpush3.bf16.msra.mxu0 %v3450_v5  ;;  %v3459_v14 = vld [vmem:[%s4529_s0 + $0xd8] sm:$0xff]   ;;  %v3463_v18 = vld [vmem:[%s4529_s0 + $0xe0] sm:$0xff]   ;;  %v3467_v22 = vld [vmem:[%s4529_s0 + $0xe8] sm:$0xff]  }
  0x15   : > { %3136 = vmatprep.subr.bf16.mxu0 %v3453_v8  ;;  %v3460_v15 = vld [vmem:[%s4529_s0 + $0x98] sm:$0xff]   ;;  %v3464_v19 = vld [vmem:[%s4529_s0 + $0xa0] sm:$0xff]   ;;  %v3468_v23 = vld [vmem:[%s4529_s0 + $0xa8] sm:$0xff]  }
  0x16   : > { %3175 = vmatpush3.bf16.msra.mxu1 %v3452_v7  ;;  %v3469_v24 = vld [vmem:[%s4529_s0 + $0x70] sm:$0xff]   ;;  %v3473_v28 = vld [vmem:[%s4529_s0 + $0x78] sm:$0xff]   ;;  %v600_v31 = vld [vmem:[%s3913_s1 + $0x8] sm:$0xff] }
  0x17   : > { %3176 = vmatprep.subr.bf16.mxu1 %v3455_v10  ;;  %v3470_v25 = vld [vmem:[%s4529_s0 + $0x30] sm:$0xff]   ;;  %v3474_v29 = vld [vmem:[%s4529_s0 + $0x38] sm:$0xff]   ;;  %v607_v32 = vld [vmem:[%s3913_s1 + $0x40] sm:$0xff] }
  0x18   : > { %3137 = vmatpush3.bf16.msra.mxu0 %v3454_v9  ;;  %v3471_v26 = vld [vmem:[%s4529_s0 + $0xf0] sm:$0xff]   ;;  %v3475_v30 = vld [vmem:[%s4529_s0 + $0xf8] sm:$0xff]   ;;  %v656_v33 = vpack.c.bf16 %v607_v32, %v600_v31  ;;  %v599_v35 = vld [vmem:[%s3913_s1] sm:$0xff] }
  0x19   : > { %3138 = vmatprep.subr.bf16.mxu0 %v3457_v12  ;;  %v3472_v27 = vld [vmem:[%s4529_s0 + $0xb0] sm:$0xff]   ;;  %v3476_v34 = vld [vmem:[%s4529_s0 + $0xb8] sm:$0xff]   ;;  %v3477_v38 = vld [vmem:[%s4529_s0 + $0x140] sm:$0xff]  }
  0x1a   : > { %3177 = vmatpush3.bf16.msra.mxu1 %v3456_v11  ;;  %v606_v36 = vld [vmem:[%s3913_s1 + $0x38] sm:$0xff]  ;;  %1127 = vmatprep.mubr.bf16.mxu0 %v656_v33  ;;  %v609_v40 = vld [vmem:[%s3913_s1 + $0x50] sm:$0xff]  ;;  %v3478_v42 = vld [vmem:[%s4529_s0 + $0x100] sm:$0xff]  }
  0x1b   : > { %3178 = vmatprep.subr.bf16.mxu1 %v3459_v14  ;;  %v655_v37 = vpack.c.bf16 %v606_v36, %v599_v35  ;;  %v602_v39 = vld [vmem:[%s3913_s1 + $0x18] sm:$0xff]  ;;  %v601_v43 = vld [vmem:[%s3913_s1 + $0x10] sm:$0xff]  ;;  %v608_v44 = vld [vmem:[%s3913_s1 + $0x48] sm:$0xff] }
  0x1c   : > { %3139 = vmatpush3.bf16.msra.mxu0 %v3458_v13  ;;  %v658_v41 = vpack.c.bf16 %v609_v40, %v602_v39  ;;  %v657_v45 = vpack.c.bf16 %v608_v44, %v601_v43  ;;  %v3479_v46 = vld [vmem:[%s4529_s0 + $0x148] sm:$0xff]   ;;  %v614_v48 = vld [vmem:[%s3913_s1 + $0x78] sm:$0xff]  ;;  %v621_v49 = vld [vmem:[%s3913_s1 + $0xb0] sm:$0xff] }
  0x1d   : > { %3140 = vmatprep.subr.bf16.mxu0 %v3461_v16  ;;  %v3480_v47 = vld [vmem:[%s4529_s0 + $0x108] sm:$0xff]   ;;  %v613_v50 = vld [vmem:[%s3913_s1 + $0x70] sm:$0xff]  ;;  %v663_v52 = vpack.c.bf16 %v621_v49, %v614_v48  ;;  %v623_v56 = vld [vmem:[%s3913_s1 + $0xc0] sm:$0xff] }
  0x1e   : > { %3179 = vmatpush3.bf16.msra.mxu1 %v3460_v15  ;;  %1192 = vmatprep.mubr.bf16.mxu1 %v658_v41  ;;  %v620_v51 = vld [vmem:[%s3913_s1 + $0xa8] sm:$0xff]  ;;  %v3481_v54 = vld [vmem:[%s4529_s0 + $0x150] sm:$0xff]   ;;  %v615_v59 = vld [vmem:[%s3913_s1 + $0x80] sm:$0xff] }
  0x1f   : > { %3180 = vmatprep.subr.bf16.mxu1 %v3463_v18  ;;  %v662_v53 = vpack.c.bf16 %v620_v51, %v613_v50  ;;  %v616_v55 = vld [vmem:[%s3913_s1 + $0x88] sm:$0xff]  ;;  %v3482_v58 = vld [vmem:[%s4529_s0 + $0x110] sm:$0xff]   ;;  %v622_v60 = vld [vmem:[%s3913_s1 + $0xb8] sm:$0xff] }
  0x20   : > { %3141 = vmatpush3.bf16.msra.mxu0 %v3462_v17  ;;  %v665_v57 = vpack.c.bf16 %v623_v56, %v616_v55  ;;  %v664_v61 = vpack.c.bf16 %v622_v60, %v615_v59  ;;  %v3483_v62 = vld [vmem:[%s4529_s0 + $0x180] sm:$0xff]   ;;  %v3484_v63 = vld [vmem:[%s4529_s0 + $0x158] sm:$0xff]   ;;  %v628_v1 = vld [vmem:[%s3913_s1 + $0xe8] sm:$0xff] }
  0x21   : > { %3142 = vmatprep.subr.bf16.mxu0 %v3465_v20  ;;  %v3485_v0 = vld [vmem:[%s4529_s0 + $0x118] sm:$0xff]   ;;  %v635_v2 = vld [vmem:[%s3913_s1 + $0x120] sm:$0xff]  ;;  %v637_v9 = vld [vmem:[%s3913_s1 + $0x130] sm:$0xff] }
  0x22   : > { %3181 = vmatpush3.bf16.msra.mxu1 %v3464_v19  ;;  %v670_v3 = vpack.c.bf16 %v635_v2, %v628_v1  ;;  %v627_v4 = vld [vmem:[%s3913_s1 + $0xe0] sm:$0xff]  ;;  %v634_v5 = vld [vmem:[%s3913_s1 + $0x118] sm:$0xff]  ;;  %v629_v12 = vld [vmem:[%s3913_s1 + $0xf0] sm:$0xff] }
  0x23   : > { %3182 = vmatprep.subr.bf16.mxu1 %v3467_v22  ;;  %v669_v6 = vpack.c.bf16 %v634_v5, %v627_v4  ;;  %v3486_v7 = vld [vmem:[%s4529_s0 + $0x160] sm:$0xff]   ;;  %v630_v8 = vld [vmem:[%s3913_s1 + $0xf8] sm:$0xff]  ;;  %v636_v13 = vld [vmem:[%s3913_s1 + $0x128] sm:$0xff] }
  0x24   : > { %3143 = vmatpush3.bf16.msra.mxu0 %v3466_v21  ;;  %v672_v10 = vpack.c.bf16 %v637_v9, %v630_v8  ;;  %v3487_v11 = vld [vmem:[%s4529_s0 + $0x120] sm:$0xff]   ;;  %v671_v14 = vpack.c.bf16 %v636_v13, %v629_v12  ;;  %v3488_v15 = vld [vmem:[%s4529_s0 + $0x168] sm:$0xff]   ;;  %v642_v17 = vld [vmem:[%s3913_s1 + $0x158] sm:$0xff] }
  0x25   : > { %3144 = vmatprep.subr.bf16.mxu0 %v3469_v24  ;;  %v3489_v16 = vld [vmem:[%s4529_s0 + $0x128] sm:$0xff]   ;;  %v649_v18 = vld [vmem:[%s3913_s1 + $0x190] sm:$0xff]  ;;  %v651_v24 = vld [vmem:[%s3913_s1 + $0x1a0] sm:$0xff] }
  0x26   : > { %3183 = vmatpush3.bf16.msra.mxu1 %v3468_v23  ;;  %v641_v19 = vld [vmem:[%s3913_s1 + $0x150] sm:$0xff]  ;;  %v677_v20 = vpack.c.bf16 %v649_v18, %v642_v17  ;;  %v648_v21 = vld [vmem:[%s3913_s1 + $0x188] sm:$0xff]  ;;  %v3493_v33 = vld [vmem:[%s4529_s0 + $0x138] sm:$0xff]  }
  0x27   : > { %3184 = vmatprep.subr.bf16.mxu1 %v3471_v26  ;;  %v3490_v22 = vld [vmem:[%s4529_s0 + $0x170] sm:$0xff]   ;;  %v644_v23 = vld [vmem:[%s3913_s1 + $0x168] sm:$0xff]  ;;  %v603_v35 = vld [vmem:[%s3913_s1 + $0x20] sm:$0xff] }
  0x28   : > { %3145 = vmatpush3.bf16.msra.mxu0 %v3470_v25  ;;  %v676_v25 = vpack.c.bf16 %v648_v21, %v641_v19  ;;  %v679_v26 = vpack.c.bf16 %v651_v24, %v644_v23  ;;  %v604_v32 = vld [vmem:[%s3913_s1 + $0x28] sm:$0xff]  ;;  %v618_v41 = vld [vmem:[%s3913_s1 + $0x98] sm:$0xff]  ;;  %v619_v44 = vld [vmem:[%s3913_s1 + $0xa0] sm:$0xff] }
  0x29   : > { %3146 = vmatprep.subr.bf16.mxu0 %v3473_v28  ;;  %v643_v28 = vld [vmem:[%s3913_s1 + $0x160] sm:$0xff]  ;;  %v612_v39 = vld [vmem:[%s3913_s1 + $0x68] sm:$0xff]  ;;  %v617_v50 = vld [vmem:[%s3913_s1 + $0x90] sm:$0xff] }
  0x2a   : > { %3185 = vmatpush3.bf16.msra.mxu1 %v3472_v27  ;;  %v3491_v27 = vld [vmem:[%s4529_s0 + $0x130] sm:$0xff]   ;;  %v640_v48 = vld [vmem:[%s3913_s1 + $0x148] sm:$0xff]  ;;  %v647_v55 = vld [vmem:[%s3913_s1 + $0x180] sm:$0xff] }
  0x2b   : > { %3186 = vmatprep.subr.bf16.mxu1 %v3475_v30  ;;  %v3492_v30 = vld [vmem:[%s4529_s0 + $0x178] sm:$0xff]   ;;  %v624_v51 = vld [vmem:[%s3913_s1 + $0xc8] sm:$0xff]  ;;  %v631_v59 = vld [vmem:[%s3913_s1 + $0x100] sm:$0xff] }
  0x2c   : > { %3147 = vmatpush3.bf16.msra.mxu0 %v3474_v29  ;;  %v650_v29 = vld [vmem:[%s3913_s1 + $0x198] sm:$0xff]  ;;  %v645_v2 = vld [vmem:[%s3913_s1 + $0x170] sm:$0xff]  ;;  %v3494_v5 = vld [vmem:[%s4509_s3] sm:$0xff]  }
  0x2d   : > { %3212 = vmatprep.subr.bf16.mxu0 %v3477_v38  ;;  %v678_v31 = vpack.c.bf16 %v650_v29, %v643_v28  ;;  %v605_v38 = vld [vmem:[%s3913_s1 + $0x30] sm:$0xff]  ;;  %v654_v56 = vld [vmem:[%s3913_s1 + $0x1b8] sm:$0xff]  ;;  %v3498_v9 = vld [vmem:[%s4509_s3 + $0x20] sm:$0xff]  }
  0x2e   : > { %3187 = vmatpush3.bf16.msra.mxu1 %v3476_v34  ;;  %v611_v34 = vld [vmem:[%s3913_s1 + $0x60] sm:$0xff]  ;;  %v661_v40 = vpack.c.bf16 %v612_v39, %v605_v38  ;;  %v638_v60 = vld [vmem:[%s3913_s1 + $0x138] sm:$0xff] }
  0x2f   : > { %1128 = vmatmul.mubr.bf16.vlgmr.msra.gmra.mrb[0].mxu0 %v655_v37  ;;  %3312 = vmatprep.subr.bf16.mxu1 %v3483_v62  ;;  %v660_v36 = vpack.c.bf16 %v611_v34, %v604_v32  ;;  %v610_v37 = vld [vmem:[%s3913_s1 + $0x58] sm:$0xff]  ;;  %v3502_v13 = vld [vmem:[%s4511_s5] sm:$0xff]  }
  0x30   : > { %3213 = vmatpush3.bf16.msra.mxu0 %v3478_v42  ;;  %1135 = vmatprep.mubr.bf16.mxu0 %v663_v52  ;;  %v625_v42 = vld [vmem:[%s3913_s1 + $0xd0] sm:$0xff]  ;;  %v659_v43 = vpack.c.bf16 %v610_v37, %v603_v35  ;;  %v632_v52 = vld [vmem:[%s3913_s1 + $0x108] sm:$0xff]  ;;  %v3497_v8 = vld [vmem:[%s4509_s3 + $0x18] sm:$0xff]  }
  0x31   : > { %1193 = vmatmul.mubr.bf16.vlgmr.msra.gmra.mrb[0].mxu1 %v657_v45  ;;  %3214 = vmatprep.subr.bf16.mxu0 %v3479_v46  ;;  %v626_v45 = vld [vmem:[%s3913_s1 + $0xd8] sm:$0xff]  ;;  %v667_v46 = vpack.c.bf16 %v625_v42, %v618_v41 }
  0x32   : > { %1200 = vmatprep.mubr.bf16.mxu1 %v665_v57  ;;  %3313 = vmatpush3.bf16.msra.mxu1 %v3483_v62  ;;  %v668_v49 = vpack.c.bf16 %v626_v45, %v619_v44  ;;  %v666_v57 = vpack.c.bf16 %v624_v51, %v617_v50  ;;  %v646_v62 = vld [vmem:[%s3913_s1 + $0x178] sm:$0xff] }
  0x33   : > { %v3501_v12 = vld [vmem:[%s4509_s3 + $0x38] sm:$0xff]   ;;  %3346 = vmatprep.subr.bf16.mxu1 %v3502_v13 }
  0x34   : > { %3215 = vmatpush3.bf16.msra.mxu0 %v3480_v47  ;;  %v633_v47 = vld [vmem:[%s3913_s1 + $0x110] sm:$0xff] }
  0x35   : > { %3216 = vmatprep.subr.bf16.mxu0 %v3481_v54  ;;  %v675_v54 = vpack.c.bf16 %v640_v48, %v633_v47 }
  0x37   : > { %1136 = vmatmul.mubr.bf16.gmra.mrb[4].mxu0 %v662_v53  ;;  %v639_v53 = vld [vmem:[%s3913_s1 + $0x140] sm:$0xff] }
  0x38   : > { %3217 = vmatpush3.bf16.msra.mxu0 %v3482_v58  ;;  %1143 = vmatprep.mubr.bf16.mxu0 %v670_v3  ;;  %v674_v58 = vpack.c.bf16 %v639_v53, %v632_v52  ;;  %v652_v3 = vld [vmem:[%s3913_s1 + $0x1a8] sm:$0xff] }
  0x39   : > { %1201 = vmatmul.mubr.bf16.gmra.mrb[4].mxu1 %v664_v61  ;;  %3218 = vmatprep.subr.bf16.mxu0 %v3484_v63  ;;  %v682_v61 = vpack.c.bf16 %v654_v56, %v647_v55  ;;  %v653_v63 = vld [vmem:[%s3913_s1 + $0x1b0] sm:$0xff]  ;;  %v680_v4 = vpack.c.bf16 %v652_v3, %v645_v2 }
  0x3a   : > { %1208 = vmatprep.mubr.bf16.mxu1 %v672_v10  ;;  %v681_v1 = vpack.c.bf16 %v653_v63, %v646_v62  ;;  %v3499_v10 = vld [vmem:[%s4509_s3 + $0x28] sm:$0xff]  }
  0x3c   : > { %3219 = vmatpush3.bf16.msra.mxu0 %v3485_v0  ;;  %v673_v0 = vpack.c.bf16 %v638_v60, %v631_v59 }
  0x3d   : > { %3220 = vmatprep.subr.bf16.mxu0 %v3486_v7  ;;  %v3496_v7 = vld [vmem:[%s4509_s3 + $0x10] sm:$0xff]  }
  0x3f   : > { %1144 = vmatmul.mubr.bf16.gmra.mrb[8].mxu0 %v669_v6  ;;  %v3495_v6 = vld [vmem:[%s4509_s3 + $0x8] sm:$0xff]  }
  0x40   : > { %3221 = vmatpush3.bf16.msra.mxu0 %v3487_v11  ;;  %1151 = vmatprep.mubr.bf16.mxu0 %v677_v20  ;;  %v3500_v11 = vld [vmem:[%s4509_s3 + $0x30] sm:$0xff]  }
  0x41   : > { %3222 = vmatprep.subr.bf16.mxu0 %v3488_v15  ;;  %1209 = vmatmul.mubr.bf16.gmra.mrb[8].mxu1 %v671_v14  ;;  %v3503_v14 = vld [vmem:[%s4511_s5 + $0x8] sm:$0xff]  }
  0x42   : > { %1216 = vmatprep.mubr.bf16.mxu1 %v679_v26 }
  0x44   : > { %3223 = vmatpush3.bf16.msra.mxu0 %v3489_v16  ;;  %v2976_v16 = vld [vmem:[%s4531_s21] ss:$0 sm:$0xff] }
  0x45   : > { %3224 = vmatprep.subr.bf16.mxu0 %v3490_v22 }
  0x47   : > { %1152 = vmatmul.mubr.bf16.gmra.mrb[12].mxu0 %v676_v25 }
  0x48   : > { %3225 = vmatpush3.bf16.msra.mxu0 %v3491_v27  ;;  %1257 = vmatprep.mubr.bf16.mxu0 %v660_v36 }
  0x49   : > { %3226 = vmatprep.subr.bf16.mxu0 %v3492_v30  ;;  %1217 = vmatmul.mubr.bf16.gmra.mrb[12].mxu1 %v678_v31 }
  0x4a   : > { %3314 = vmatprep.mubr.msk.bf16.mxu1 %vm1082_vm0, %v661_v40 }
  0x4c   : > { %3227 = vmatpush3.bf16.msra.mxu0 %v3493_v33 }
  0x4d   : > { %3322 = vmatprep.subr.bf16.mxu0 %v3494_v5 }
  0x4f   : > { %1258 = vmatmul.mubr.bf16.vlgmr.msra.gmra.mrb[16].mxu0 %v659_v43 }
  0x50   : > { %1265 = vmatprep.mubr.bf16.mxu0 %v667_v46  ;;  %3323 = vmatpush3.bf16.msra.mxu0 %v3494_v5 }
  0x51   : > { %3315 = vmatmul.mubr.msk.bf16.vlgmr.msra.gmra.mrb[16].mxu1 %vm1082_vm0, %v668_v49  ;;  %3324 = vmatprep.subr.bf16.mxu0 %v3495_v6 }
  0x52   : > { %3318 = vmatprep.mubr.msk.bf16.mxu1 %vm1082_vm0, %v675_v54  ;;  %3347 = vmatpush3.bf16.msra.mxu1 %v3502_v13 }
  0x53   : > { %3348 = vmatprep.subr.bf16.mxu1 %v3503_v14 }
  0x54   : > { %3325 = vmatpush3.bf16.msra.mxu0 %v3495_v6 }
  0x55   : > { %3326 = vmatprep.subr.bf16.mxu0 %v3496_v7 }
  0x56   : > { %3349 = vmatpush3.bf16.msra.mxu1 %v3503_v14 }
  0x57   : > { %1266 = vmatmul.mubr.bf16.gmra.mrb[20].mxu0 %v666_v57 }
  0x58   : > { %1273 = vmatprep.mubr.bf16.mxu0 %v674_v58  ;;  %3327 = vmatpush3.bf16.msra.mxu0 %v3496_v7 }
  0x59   : > { %3319 = vmatmul.mubr.msk.bf16.gmra.mrb[20].mxu1 %vm1082_vm0, %v682_v61  ;;  %3328 = vmatprep.subr.bf16.mxu0 %v3497_v8 }
  0x5c   : > { %3329 = vmatpush3.bf16.msra.mxu0 %v3497_v8 }
  0x5d   : > { %3330 = vmatprep.subr.bf16.mxu0 %v3498_v9 }
  0x5f   : > { %1274 = vmatmul.mubr.bf16.gmra.mrb[24].mxu0 %v673_v0 }
  0x60   : > { %1281 = vmatprep.mubr.bf16.mxu0 %v681_v1  ;;  %3331 = vmatpush3.bf16.msra.mxu0 %v3498_v9 }
  0x61   : > { %3332 = vmatprep.subr.bf16.mxu0 %v3499_v10 }
  0x64   : > { %3333 = vmatpush3.bf16.msra.mxu0 %v3499_v10 }
  0x65   : > { %3334 = vmatprep.subr.bf16.mxu0 %v3500_v11 }
  0x67   : > { %1282 = vmatmul.mubr.bf16.gmra.mrb[28].mxu0 %v680_v4 }
  0x68   : > { %3335 = vmatpush3.bf16.msra.mxu0 %v3500_v11 }
  0x69   : > { %3336 = vmatprep.subr.bf16.mxu0 %v3501_v12 }
  0x6c   : > { %3337 = vmatpush3.bf16.msra.mxu0 %v3501_v12 }
 0x102   : > { %v3148_v15 = vpop.f32.mrb[0].mxu0 }
 0x103   : > { %v3149_v17 = vpop.f32.mrb[1].mxu0 }
 0x104   : > { %v3150_v18 = vadd.f32 %v3149_v17, %v3148_v15  ;;  %v3151_v19 = vpop.f32.mrb[2].mxu0  ;;  %v3188_v20 = vpop.f32.mrb[0].mxu1 }
 0x105   : > { %v3152_v21 = vpop.f32.mrb[3].mxu0  ;;  %v3189_v24 = vpop.f32.mrb[1].mxu1 }
 0x106   : > { %v1130_v22 = vadd.f32 %v3150_v18, %v2976_v16  ;;  %v3153_v23 = vadd.f32 %v3152_v21, %v3151_v19  ;;  %v3190_v25 = vadd.f32 %v3189_v24, %v3188_v20  ;;  %v3191_v26 = vpop.f32.mrb[2].mxu1 }
 0x107   : > { %v3192_v28 = vpop.f32.mrb[3].mxu1 }
 0x108   : > { %v1133_v27 = vadd.f32 %v3153_v23, %v2976_v16  ;;  %v1195_v29 = vadd.f32 %v3190_v25, %v1130_v22  ;;  %v3193_v30 = vadd.f32 %v3192_v28, %v3191_v26 }
 0x10a   : > { %v3154_v31 = vpop.f32.mrb[4].mxu0  ;;  %v1198_v32 = vadd.f32 %v3193_v30, %v1133_v27 }
 0x10b   : > { %v3155_v33 = vpop.f32.mrb[5].mxu0 }
 0x10c   : > { %v3156_v34 = vadd.f32 %v3155_v33, %v3154_v31  ;;  %v3157_v35 = vpop.f32.mrb[6].mxu0  ;;  %v3194_v36 = vpop.f32.mrb[4].mxu1 }
 0x10d   : > { %v3158_v37 = vpop.f32.mrb[7].mxu0  ;;  %v3195_v40 = vpop.f32.mrb[5].mxu1 }
 0x10e   : > { %v1138_v38 = vadd.f32 %v3156_v34, %v2976_v16  ;;  %v3159_v39 = vadd.f32 %v3158_v37, %v3157_v35  ;;  %v3196_v41 = vadd.f32 %v3195_v40, %v3194_v36  ;;  %v3197_v42 = vpop.f32.mrb[6].mxu1 }
 0x10f   : > { %v3198_v44 = vpop.f32.mrb[7].mxu1 }
 0x110   : > { %v1141_v43 = vadd.f32 %v3159_v39, %v2976_v16  ;;  %v1203_v45 = vadd.f32 %v3196_v41, %v1138_v38  ;;  %v3199_v46 = vadd.f32 %v3198_v44, %v3197_v42 }
 0x112   : > { %v3160_v47 = vpop.f32.mrb[8].mxu0  ;;  %v1206_v48 = vadd.f32 %v3199_v46, %v1141_v43 }
 0x113   : > { %v3161_v49 = vpop.f32.mrb[9].mxu0 }
 0x114   : > { %v3162_v50 = vadd.f32 %v3161_v49, %v3160_v47  ;;  %v3163_v51 = vpop.f32.mrb[10].mxu0  ;;  %v3200_v52 = vpop.f32.mrb[8].mxu1 }
 0x115   : > { %v3164_v53 = vpop.f32.mrb[11].mxu0  ;;  %v3201_v56 = vpop.f32.mrb[9].mxu1 }
 0x116   : > { %v1146_v54 = vadd.f32 %v3162_v50, %v2976_v16  ;;  %v3165_v55 = vadd.f32 %v3164_v53, %v3163_v51  ;;  %v3202_v57 = vadd.f32 %v3201_v56, %v3200_v52  ;;  %v3203_v58 = vpop.f32.mrb[10].mxu1 }
 0x117   : > { %v3204_v60 = vpop.f32.mrb[11].mxu1 }
 0x118   : > { %v1149_v59 = vadd.f32 %v3165_v55, %v2976_v16  ;;  %v1211_v61 = vadd.f32 %v3202_v57, %v1146_v54  ;;  %v3205_v62 = vadd.f32 %v3204_v60, %v3203_v58 }
 0x11a   : > { %v3166_v63 = vpop.f32.mrb[12].mxu0  ;;  %v1214_v0 = vadd.f32 %v3205_v62, %v1149_v59 }
 0x11b   : > { %v3167_v1 = vpop.f32.mrb[13].mxu0 }
 0x11c   : > { %v3168_v2 = vadd.f32 %v3167_v1, %v3166_v63  ;;  %v3169_v3 = vpop.f32.mrb[14].mxu0  ;;  %v3206_v4 = vpop.f32.mrb[12].mxu1 }
 0x11d   : > { %v3170_v5 = vpop.f32.mrb[15].mxu0  ;;  %v3207_v8 = vpop.f32.mrb[13].mxu1 }
 0x11e   : > { %v1154_v6 = vadd.f32 %v3168_v2, %v2976_v16  ;;  %v3171_v7 = vadd.f32 %v3170_v5, %v3169_v3  ;;  %v3208_v9 = vadd.f32 %v3207_v8, %v3206_v4  ;;  %v3209_v10 = vpop.f32.mrb[14].mxu1 }
 0x11f   : > { %v3210_v12 = vpop.f32.mrb[15].mxu1 }
 0x120   : > { %v1157_v11 = vadd.f32 %v3171_v7, %v2976_v16  ;;  %v1219_v13 = vadd.f32 %v3208_v9, %v1154_v6  ;;  %v3211_v14 = vadd.f32 %v3210_v12, %v3209_v10 }
 0x122   : > { %v3228_v15 = vpop.f32.mrb[16].mxu0  ;;  %v1222_v17 = vadd.f32 %v3211_v14, %v1157_v11  ;;  %v3505_v14 = vld [vmem:[%s4511_s5 + $0x18] sm:$0xff]  }
 0x123   : > { %v3229_v18 = vpop.f32.mrb[17].mxu0 }
 0x124   : > { %v3230_v19 = vadd.f32 %v3229_v18, %v3228_v15  ;;  %v3231_v20 = vpop.f32.mrb[18].mxu0  ;;  %v3316_v22 = vpop.f32.mrb[16].mxu1  ;;  %v3030_v15 = vld [vmem:[%s4510_s4] ss:$0 sm:$0xff] }
 0x125   : > { %v3232_v21 = vpop.f32.mrb[19].mxu0  ;;  %v1324_v25 = vpop.f32.mrb[17].mxu1 }
 0x126   : > { %v3233_v23 = vadd.f32 %v3232_v21, %v3231_v20  ;;  %v1260_v24 = vadd.f32 %v3230_v19, %v1195_v29  ;;  %v3317_v26 = vpop.f32.mrb[18].mxu1 }
 0x127   : > { %v1327_v30 = vpop.f32.mrb[19].mxu1 }
 0x128   : > { %v1325_v27 = vadd.f32 %v1324_v25, %v1260_v24  ;;  %v1263_v28 = vadd.f32 %v3233_v23, %v1198_v32 }
 0x12a   : > { %v1328_v31 = vadd.f32 %v1327_v30, %v1263_v28  ;;  %v3234_v33 = vpop.f32.mrb[20].mxu0  ;;  %v1355_v34 = vmax.f32 %v1325_v27, 0.0 }
 0x12b   : > { %v3235_v16 = vpop.f32.mrb[21].mxu0 }
 0x12c   : > { %v1356_v35 = vmax.f32 %v1328_v31, 0.0  ;;  %v3236_v36 = vadd.f32 %v3235_v16, %v3234_v33  ;;  %v3237_v37 = vpop.f32.mrb[22].mxu0  ;;  %v3320_v39 = vpop.f32.mrb[20].mxu1 }
 0x12d   : > { %v3238_v38 = vpop.f32.mrb[23].mxu0  ;;  %v1340_v43 = vpop.f32.mrb[21].mxu1 }
 0x12e   : > { %v1363_v40 = vpack.c.bf16 %v1356_v35, %v1355_v34  ;;  %v1268_v41 = vadd.f32 %v3236_v36, %v1203_v45  ;;  %v3239_v42 = vadd.f32 %v3238_v38, %v3237_v37  ;;  %v3321_v44 = vpop.f32.mrb[22].mxu1 }
 0x12f   : > { %v1343_v47 = vpop.f32.mrb[23].mxu1 }
 0x130   : > { %v1333_v29 = vadd.f32 %v3316_v22, %v1268_v41  ;;  %v1271_v46 = vadd.f32 %v3239_v42, %v1206_v48  ;;  %3338 = vmatprep.mubr.bf16.mxu0 %v1363_v40 }
 0x132   : > { %v1336_v32 = vadd.f32 %v3317_v26, %v1271_v46  ;;  %v3240_v49 = vpop.f32.mrb[24].mxu0  ;;  %v1357_v51 = vmax.f32 %v1333_v29, 0.0 }
 0x133   : > { %v3241_v50 = vpop.f32.mrb[25].mxu0 }
 0x134   : > { %v1358_v52 = vmax.f32 %v1336_v32, 0.0  ;;  %v3242_v53 = vadd.f32 %v3241_v50, %v3240_v49  ;;  %v3243_v54 = vpop.f32.mrb[26].mxu0  ;;  %v3039_v49 = vld [vmem:[%s4512_s6] ss:$0 sm:$0xff] }
 0x135   : > { %v3244_v55 = vpop.f32.mrb[27].mxu0 }
 0x136   : > { %v1364_v56 = vpack.c.bf16 %v1358_v52, %v1357_v51  ;;  %v3245_v57 = vadd.f32 %v3244_v55, %v3243_v54  ;;  %v1276_v58 = vadd.f32 %v3242_v53, %v1211_v61 }
 0x138   : > { %v1341_v59 = vadd.f32 %v1340_v43, %v1276_v58  ;;  %3339 = vmatmul.mubr.bf16.vlgmr.msra.gmra.mrb[32].mxu0 %v1364_v56  ;;  %v1279_v45 = vadd.f32 %v3245_v57, %v1214_v0  ;;  %v3504_v0 = vld [vmem:[%s4511_s5 + $0x10] sm:$0xff]  }
 0x139   : > { %3350 = vmatprep.subr.bf16.mxu1 %v3504_v0 }
 0x13a   : > { %v1344_v60 = vadd.f32 %v1343_v47, %v1279_v45  ;;  %v3246_v62 = vpop.f32.mrb[28].mxu0  ;;  %v1359_v48 = vmax.f32 %v1341_v59, 0.0  ;;  %3351 = vmatpush3.bf16.msra.mxu1 %v3504_v0  ;;  %v1753_v47 = vld [vmem:[%s4515_s9] sm:$0x1] }
 0x13b   : > { %v3247_v63 = vpop.f32.mrb[29].mxu0  ;;  %3352 = vmatprep.subr.bf16.mxu1 %v3505_v14  ;;  %3433 = vmatprep.subr.msk.bf16.mxu0 %vm1773_vm3, %v1753_v47  ;;  %v1775_v32 = vsel %vm1773_vm3, %v1753_v47, 0  ;;  %v3507_v0 = vld [vmem:[%s4517_s11] sm:$0x1f]  }
 0x13c   : > { %v1360_v1 = vmax.f32 %v1344_v60, 0.0  ;;  %v3248_v2 = vadd.f32 %v3247_v63, %v3246_v62  ;;  %v3249_v3 = vpop.f32.mrb[30].mxu0  ;;  %3373 = vmatpush3.bf16.msra.mxu0 %v1775_v32 }
 0x13d   : > { %v3250_v4 = vpop.f32.mrb[31].mxu0 }
 0x13e   : > { %v1365_v5 = vpack.c.bf16 %v1360_v1, %v1359_v48  ;;  %v1284_v6 = vadd.f32 %v3248_v2, %v1219_v13  ;;  %v3251_v7 = vadd.f32 %v3250_v4, %v3249_v3  ;;  %3353 = vmatpush3.bf16.msra.mxu1 %v3505_v14  ;;  %v3506_v13 = vld [vmem:[%s4513_s7] sm:$0x1f]   ;;  %v1881_v14 = vsel %vm1671_vm1, %v3507_v0, 0 }
 0x13f   : > { %3432 = vmatprep.subr.msk.bf16.mxu1 %vm1671_vm1, %v3506_v13  ;;  %v1673_v33 = vsel %vm1671_vm1, %v3506_v13, 0  ;;  %v3048_v13 = vld [vmem:[%s4514_s8] ss:$0 sm:$0xff] }
 0x140   : > { %v1349_v8 = vadd.f32 %v3320_v39, %v1284_v6  ;;  %v1287_v9 = vadd.f32 %v3251_v7, %v1222_v17  ;;  %3342 = vmatprep.mubr.bf16.mxu0 %v1365_v5 }
 0x142   : > { %v1352_v10 = vadd.f32 %v3321_v44, %v1287_v9  ;;  %v1361_v11 = vmax.f32 %v1349_v8, 0.0 }
 0x144   : > { %v1362_v61 = vmax.f32 %v1352_v10, 0.0 }
 0x146   : > { %v1366_v12 = vpack.c.bf16 %v1362_v61, %v1361_v11 }
 0x148   : > { %3343 = vmatmul.mubr.bf16.gmra.mrb[36].mxu0 %v1366_v12 }
 0x20b   : > { %v3340_v17 = vpop.f32.mrb[32].mxu0 }
 0x20c   : > { %v1481_v18 = vadd.f32 %v3340_v17, %v3030_v15  ;;  %v1472_v19 = vpop.f32.mrb[33].mxu0 }
 0x20d   : > { %v1473_v20 = vadd.f32 %v3030_v15, %v1472_v19  ;;  %v3341_v21 = vpop.f32.mrb[34].mxu0 }
 0x20e   : > { %v1484_v22 = vadd.f32 %v3341_v21, %v3030_v15  ;;  %v1475_v23 = vpop.f32.mrb[35].mxu0  ;;  %v1505_v25 = vmax.f32 %v1481_v18, 0.0 }
 0x20f   : > { %v1476_v24 = vadd.f32 %v3030_v15, %v1475_v23  ;;  %v1503_v27 = vmax.f32 %v1473_v20, 0.0 }
 0x210   : > { %v1506_v26 = vmax.f32 %v1484_v22, 0.0 }
 0x211   : > { %v1504_v28 = vmax.f32 %v1476_v24, 0.0 }
 0x212   : > { %v1512_v30 = vpack.c.bf16 %v1506_v26, %v1505_v25 }
 0x213   : > { %v1511_v31 = vpack.c.bf16 %v1504_v28, %v1503_v27 }
 0x215   : > { %3354 = vmatprep.mubr.msk.bf16.mxu1 %vm1554_vm2, %v1511_v31 }
 0x216   : > { %3355 = vmatmul.mubr.msk.bf16.vlgmr.msra.gmra.mrb[24].mxu1 %vm1554_vm2, %v1512_v30 }
 0x217   : > { %3363 = vmatpush3.bf16.msra.mxu1 %v1673_v33 }
 0x218   : > { %3434 = vmatprep.subr.msk.bf16.mxu1 %vm1671_vm1, %v3507_v0  ;;  %v3530_v0 = vld [vmem:[%s4521_s15 + $0xa8] ss:$28 sps:$4 sm:$0xff]  }
 0x21b   : > { %v3344_v16 = vpop.f32.mrb[36].mxu0 }
 0x21c   : > { %v1497_v34 = vadd.f32 %v3344_v16, %v3030_v15  ;;  %v1488_v35 = vpop.f32.mrb[37].mxu0 }
 0x21d   : > { %v1489_v36 = vadd.f32 %v3030_v15, %v1488_v35  ;;  %v3345_v37 = vpop.f32.mrb[38].mxu0 }
 0x21e   : > { %v1500_v38 = vadd.f32 %v3345_v37, %v3030_v15  ;;  %v1491_v39 = vpop.f32.mrb[39].mxu0  ;;  %v1509_v41 = vmax.f32 %v1497_v34, 0.0  ;;  %v3508_v37 = vld [vmem:[%s4519_s13] sm:$0xff]  }
 0x21f   : > { %v1492_v40 = vadd.f32 %v3030_v15, %v1491_v39  ;;  %v1507_v43 = vmax.f32 %v1489_v36, 0.0  ;;  %3392 = vmatprep.subr.bf16.mxu0 %v3508_v37  ;;  %v3054_v39 = vld [vmem:[%s4516_s10] ss:$0 sm:$0xff] }
 0x220   : > { %v1510_v42 = vmax.f32 %v1500_v38, 0.0  ;;  %v3509_v38 = vld [vmem:[%s4519_s13 + $0x8] sm:$0xff]  }
 0x221   : > { %v1508_v44 = vmax.f32 %v1492_v40, 0.0 }
 0x222   : > { %v1514_v29 = vpack.c.bf16 %v1510_v42, %v1509_v41 }
 0x223   : > { %v1513_v46 = vpack.c.bf16 %v1508_v44, %v1507_v43 }
 0x225   : > { %3358 = vmatprep.mubr.msk.bf16.mxu1 %vm1554_vm2, %v1513_v46 }
 0x226   : > { %3359 = vmatmul.mubr.msk.bf16.gmra.mrb[28].mxu1 %vm1554_vm2, %v1514_v29 }
 0x2e9   : > { %v3356_v50 = vpop.f32.mrb[24].mxu1 }
 0x2ea   : > { %v1610_v51 = vadd.f32 %v3356_v50, %v3039_v49  ;;  %v1601_v52 = vpop.f32.mrb[25].mxu1 }
 0x2eb   : > { %v1602_v53 = vadd.f32 %v3039_v49, %v1601_v52  ;;  %v3357_v54 = vpop.f32.mrb[26].mxu1 }
 0x2ec   : > { %v1613_v55 = vadd.f32 %v3357_v54, %v3039_v49  ;;  %v1604_v56 = vpop.f32.mrb[27].mxu1  ;;  %v1634_v58 = vmax.f32 %v1610_v51, 0.0 }
 0x2ed   : > { %v1605_v57 = vadd.f32 %v3039_v49, %v1604_v56  ;;  %v1632_v45 = vmax.f32 %v1602_v53, 0.0 }
 0x2ee   : > { %v1635_v59 = vmax.f32 %v1613_v55, 0.0 }
 0x2ef   : > { %v1633_v60 = vmax.f32 %v1605_v57, 0.0 }
 0x2f0   : > { %v1641_v62 = vpack.c.bf16 %v1635_v59, %v1634_v58 }
 0x2f1   : > { %v1640_v63 = vpack.c.bf16 %v1633_v60, %v1632_v45 }
 0x2f3   : > { %3364 = vmatprep.mubr.msk.bf16.mxu1 %vm1658_vm4, %v1640_v63 }
 0x2f4   : > { %3365 = vmatmul.mubr.msk.bf16.vlgmr.msra.gmra.mrb[32].mxu1 %vm1658_vm4, %v1641_v62 }
 0x2f5   : > { %3383 = vmatpush3.bf16.msra.mxu1 %v1881_v14  ;;  %v3538_v14 = vld [vmem:[%s4521_s15 + $0xe4] ss:$28 sps:$4 sm:$0xff]  }
 0x2f9   : > { %v3360_v48 = vpop.f32.mrb[28].mxu1 }
 0x2fa   : > { %v1626_v1 = vadd.f32 %v3360_v48, %v3039_v49  ;;  %v1617_v2 = vpop.f32.mrb[29].mxu1 }
 0x2fb   : > { %v1618_v3 = vadd.f32 %v3039_v49, %v1617_v2  ;;  %v3361_v4 = vpop.f32.mrb[30].mxu1 }
 0x2fc   : > { %v1629_v5 = vadd.f32 %v3361_v4, %v3039_v49  ;;  %v1620_v6 = vpop.f32.mrb[31].mxu1  ;;  %v1638_v8 = vmax.f32 %v1626_v1, 0.0  ;;  %v3510_v4 = vld [vmem:[%s4519_s13 + $0x10] sm:$0xff]  }
 0x2fd   : > { %v1621_v7 = vadd.f32 %v3039_v49, %v1620_v6  ;;  %v1636_v10 = vmax.f32 %v1618_v3, 0.0  ;;  %v3512_v6 = vld [vmem:[%s4521_s15] ss:$28 sps:$4 sm:$0xff]  }
 0x2fe   : > { %v1639_v9 = vmax.f32 %v1629_v5, 0.0  ;;  %v3511_v5 = vld [vmem:[%s4519_s13 + $0x18] sm:$0xff]  }
 0x2ff   : > { %v1637_v11 = vmax.f32 %v1621_v7, 0.0  ;;  %v3514_v7 = vld [vmem:[%s4521_s15 + $0x4] ss:$28 sps:$4 sm:$0xff]  }
 0x300   : > { %v1643_v61 = vpack.c.bf16 %v1639_v9, %v1638_v8  ;;  %v3517_v8 = vld [vmem:[%s4521_s15 + $0xc] ss:$28 sps:$4 sm:$0xff]   ;;  %v3520_v9 = vld [vmem:[%s4521_s15 + $0x3c] ss:$28 sps:$4 sm:$0xff]   ;;  %2477 = vmatprep.subr.bf16.mxu1 %v3514_v7 }
 0x301   : > { %v1642_v12 = vpack.c.bf16 %v1637_v11, %v1636_v10  ;;  %v3518_v10 = vld [vmem:[%s4521_s15 + $0x38] ss:$28 sps:$4 sm:$0xff]  }
 0x302   : > { %v3526_v11 = vld [vmem:[%s4521_s15 + $0x74] ss:$28 sps:$4 sm:$0xff]  }
 0x303   : > { %3368 = vmatprep.mubr.msk.bf16.mxu1 %vm1658_vm4, %v1642_v12  ;;  %v3532_v12 = vld [vmem:[%s4521_s15 + $0xac] ss:$28 sps:$4 sm:$0xff]  }
 0x304   : > { %3369 = vmatmul.mubr.msk.bf16.gmra.mrb[36].mxu1 %vm1658_vm4, %v1643_v61  ;;  %v3524_v61 = vld [vmem:[%s4521_s15 + $0x70] ss:$28 sps:$4 sm:$0xff]  }
 0x3c7   : > { %v3366_v15 = vpop.f32.mrb[32].mxu1 }
 0x3c8   : > { %v1718_v17 = vadd.f32 %v3366_v15, %v3048_v13  ;;  %v1709_v18 = vpop.f32.mrb[33].mxu1  ;;  %v3544_v15 = vld [vmem:[%s4521_s15 + $0x11c] ss:$28 sps:$4 sm:$0xff]  }
 0x3c9   : > { %v1710_v19 = vadd.f32 %v3048_v13, %v1709_v18  ;;  %v3367_v20 = vpop.f32.mrb[34].mxu1  ;;  %v3059_v18 = vld [vmem:[%s4518_s12] ss:$0 sm:$0xff] }
 0x3ca   : > { %1743 = vst.msk [vmem:[%s589_s28 + $0x10] sm:$0xff] %vm1740_vm5, %v1718_v17  ;;  %v1721_v21 = vadd.f32 %v3367_v20, %v3048_v13  ;;  %v1712_v22 = vpop.f32.mrb[35].mxu1 }
 0x3cb   : > { %1741 = vst.msk [vmem:[%s589_s28] sm:$0xff] %vm1740_vm5, %v1710_v19  ;;  %v1713_v23 = vadd.f32 %v3048_v13, %v1712_v22 }
 0x3cc   : > { %1744 = vst.msk [vmem:[%s589_s28 + $0x18] sm:$0xff] %vm1740_vm5, %v1721_v21  ;;  %v1750_v24 = vpack.c.bf16 %v1721_v21, %v1718_v17  ;;  %v3542_v17 = vld [vmem:[%s4521_s15 + $0x118] ss:$28 sps:$4 sm:$0xff]  }
 0x3cd   : > { %1742 = vst.msk [vmem:[%s589_s28 + $0x8] sm:$0xff] %vm1740_vm5, %v1713_v23  ;;  %v1749_v25 = vpack.c.bf16 %v1713_v23, %v1710_v19 }
 0x3cf   : > { %3374 = vmatprep.mubr.msk.bf16.mxu0 %vm1740_vm5, %v1749_v25 }
 0x3d0   : > { %3375 = vmatmul.mubr.msk.bf16.vlgmr.msra.gmra.mrb[40].mxu0 %vm1740_vm5, %v1750_v24 }
 0x3d1   : > { %3393 = vmatpush3.bf16.msra.mxu0 %v3508_v37  ;;  %v3529_v37 = vld [vmem:[%s4521_s15 + $0x7c] ss:$28 sps:$4 sm:$0xff]  }
 0x3d2   : > { %3394 = vmatprep.subr.bf16.mxu0 %v3509_v38 }
 0x3d5   : > { %3395 = vmatpush3.bf16.msra.mxu0 %v3509_v38 }
 0x3d6   : > { %3396 = vmatprep.subr.bf16.mxu0 %v3510_v4 }
 0x3d7   : > { %v3370_v26 = vpop.f32.mrb[36].mxu1 }
 0x3d8   : > { %v1734_v27 = vadd.f32 %v3370_v26, %v3048_v13  ;;  %v1725_v28 = vpop.f32.mrb[37].mxu1 }
 0x3d9   : > { %v1726_v30 = vadd.f32 %v3048_v13, %v1725_v28  ;;  %v3371_v31 = vpop.f32.mrb[38].mxu1  ;;  %3397 = vmatpush3.bf16.msra.mxu0 %v3510_v4  ;;  %v3562_v4 = vld [vmem:[%s4521_s15 + $0x14] ss:$28 sps:$4 sm:$0xff]  }
 0x3da   : > { %1747 = vst.msk [vmem:[%s589_s28 + $0x30] sm:$0xff] %vm1740_vm5, %v1734_v27  ;;  %v1737_v33 = vadd.f32 %v3371_v31, %v3048_v13  ;;  %v1728_v16 = vpop.f32.mrb[39].mxu1  ;;  %3398 = vmatprep.subr.bf16.mxu0 %v3511_v5 }
 0x3db   : > { %1745 = vst.msk [vmem:[%s589_s28 + $0x20] sm:$0xff] %vm1740_vm5, %v1726_v30  ;;  %v1729_v34 = vadd.f32 %v3048_v13, %v1728_v16  ;;  %v3536_v13 = vld [vmem:[%s4521_s15 + $0xe0] ss:$28 sps:$4 sm:$0xff]  }
 0x3dc   : > { %1748 = vst.msk [vmem:[%s589_s28 + $0x38] sm:$0xff] %vm1740_vm5, %v1737_v33  ;;  %v1752_v35 = vpack.c.bf16 %v1737_v33, %v1734_v27 }
 0x3dd   : > { %1746 = vst.msk [vmem:[%s589_s28 + $0x28] sm:$0xff] %vm1740_vm5, %v1729_v34  ;;  %v1751_v36 = vpack.c.bf16 %v1729_v34, %v1726_v30  ;;  %3399 = vmatpush3.bf16.msra.mxu0 %v3511_v5  ;;  %v3515_v34 = vld [vmem:[%s4521_s15 + $0x8] ss:$28 sps:$4 sm:$0xff]   ;;  %v3563_v5 = vld [vmem:[%s4521_s15 + $0x18] ss:$28 sps:$4 sm:$0xff]  }
 0x3de   : > { %2550 = vmatprep.subr.bf16.mxu0 %v3517_v8 }
 0x3df   : > { %3378 = vmatprep.mubr.msk.bf16.mxu0 %vm1740_vm5, %v1751_v36  ;;  %v3521_v36 = vld [vmem:[%s4521_s15 + $0x40] ss:$28 sps:$4 sm:$0xff]  }
 0x3e0   : > { %3379 = vmatmul.mubr.msk.bf16.gmra.mrb[44].mxu0 %vm1740_vm5, %v1752_v35  ;;  %v3523_v35 = vld [vmem:[%s4521_s15 + $0x44] ss:$28 sps:$4 sm:$0xff]  }
 0x4a3   : > { %v3376_v40 = vpop.f32.mrb[40].mxu0 }
 0x4a4   : > { %v1820_v41 = vadd.f32 %v3376_v40, %v3054_v39  ;;  %v1811_v42 = vpop.f32.mrb[41].mxu0 }
 0x4a5   : > { %v1812_v43 = vadd.f32 %v3054_v39, %v1811_v42  ;;  %v3377_v44 = vpop.f32.mrb[42].mxu0  ;;  %v3535_v42 = vld [vmem:[%s4521_s15 + $0xb4] ss:$28 sps:$4 sm:$0xff]  }
 0x4a6   : > { %v1823_v29 = vadd.f32 %v3377_v44, %v3054_v39  ;;  %v1814_v46 = vpop.f32.mrb[43].mxu0  ;;  %v1844_v32 = vmax.f32 %v1820_v41, 0.0 }
 0x4a7   : > { %v1815_v47 = vadd.f32 %v3054_v39, %v1814_v46  ;;  %v1842_v50 = vmax.f32 %v1812_v43, 0.0 }
 0x4a8   : > { %v1845_v49 = vmax.f32 %v1823_v29, 0.0 }
 0x4a9   : > { %v1843_v51 = vmax.f32 %v1815_v47, 0.0 }
 0x4aa   : > { %v1851_v52 = vpack.c.bf16 %v1845_v49, %v1844_v32  ;;  %v3533_v32 = vld [vmem:[%s4521_s15 + $0xb0] ss:$28 sps:$4 sm:$0xff]  }
 0x4ab   : > { %v1850_v53 = vpack.c.bf16 %v1843_v51, %v1842_v50  ;;  %v3541_v51 = vld [vmem:[%s4521_s15 + $0xec] ss:$28 sps:$4 sm:$0xff]  }
 0x4ad   : > { %3384 = vmatprep.mubr.msk.bf16.mxu1 %vm1658_vm4, %v1850_v53 }
 0x4ae   : > { %3385 = vmatmul.mubr.msk.bf16.vlgmr.msra.gmra.mrb[40].mxu1 %vm1658_vm4, %v1851_v52 }
 0x4af   : > { %2478 = vmatpush1.bf16.msra.mxu1 %v3512_v6  ;;  %v3065_v6 = vld [vmem:[%s4520_s14] ss:$0 sm:$0xff] }
 0x4b0   : > { %2479 = vmatprep.subr.bf16.mxu1 %v3520_v9 }
 0x4b3   : > { %v3380_v54 = vpop.f32.mrb[44].mxu0  ;;  %2480 = vmatpush1.bf16.msra.mxu1 %v3518_v10 }
 0x4b4   : > { %v1836_v55 = vadd.f32 %v3380_v54, %v3054_v39  ;;  %v1827_v56 = vpop.f32.mrb[45].mxu0  ;;  %2481 = vmatprep.subr.bf16.mxu1 %v3526_v11 }
 0x4b5   : > { %v1828_v57 = vadd.f32 %v3054_v39, %v1827_v56  ;;  %v3381_v58 = vpop.f32.mrb[46].mxu0  ;;  %v3539_v56 = vld [vmem:[%s4521_s15 + $0xe8] ss:$28 sps:$4 sm:$0xff]  }
 0x4b6   : > { %v1839_v59 = vadd.f32 %v3381_v58, %v3054_v39  ;;  %v1830_v45 = vpop.f32.mrb[47].mxu0  ;;  %v1848_v62 = vmax.f32 %v1836_v55, 0.0  ;;  %v3545_v58 = vld [vmem:[%s4521_s15 + $0x120] ss:$28 sps:$4 sm:$0xff]  }
 0x4b7   : > { %v1831_v60 = vadd.f32 %v3054_v39, %v1830_v45  ;;  %v1846_v48 = vmax.f32 %v1828_v57, 0.0  ;;  %2482 = vmatpush1.bf16.msra.mxu1 %v3524_v61  ;;  %v3527_v39 = vld [vmem:[%s4521_s15 + $0x78] ss:$28 sps:$4 sm:$0xff]   ;;  %v3547_v57 = vld [vmem:[%s4521_s15 + $0x124] ss:$28 sps:$4 sm:$0xff]  }
 0x4b8   : > { %v1849_v63 = vmax.f32 %v1839_v59, 0.0  ;;  %2483 = vmatprep.subr.bf16.mxu1 %v3532_v12  ;;  %v3550_v59 = vld [vmem:[%s4521_s15 + $0x154] ss:$28 sps:$4 sm:$0xff]   ;;  %v3553_v45 = vld [vmem:[%s4521_s15 + $0x15c] ss:$28 sps:$4 sm:$0xff]  }
 0x4b9   : > { %v1847_v1 = vmax.f32 %v1831_v60, 0.0  ;;  %v3548_v60 = vld [vmem:[%s4521_s15 + $0x150] ss:$28 sps:$4 sm:$0xff]  }
 0x4ba   : > { %v1853_v2 = vpack.c.bf16 %v1849_v63, %v1848_v62  ;;  %v3551_v62 = vld [vmem:[%s4521_s15 + $0x158] ss:$28 sps:$4 sm:$0xff]   ;;  %v3556_v63 = vld [vmem:[%s4521_s15 + $0x18c] ss:$28 sps:$4 sm:$0xff]  }
 0x4bb   : > { %v1852_v3 = vpack.c.bf16 %v1847_v1, %v1846_v48  ;;  %2484 = vmatpush1.bf16.msra.mxu1 %v3530_v0  ;;  %v3559_v48 = vld [vmem:[%s4521_s15 + $0x194] ss:$28 sps:$4 sm:$0xff]   ;;  %v3554_v1 = vld [vmem:[%s4521_s15 + $0x188] ss:$28 sps:$4 sm:$0xff]  }
 0x4bc   : > { %2485 = vmatprep.subr.bf16.mxu1 %v3538_v14 }
 0x4bd   : > { %3388 = vmatprep.mubr.msk.bf16.mxu1 %vm1658_vm4, %v1852_v3  ;;  %v3712_v3 = vmov 0  }
 0x4be   : > { %3389 = vmatmul.mubr.msk.bf16.gmra.mrb[44].mxu1 %vm1658_vm4, %v1853_v2  ;;  %v3557_v2 = vld [vmem:[%s4521_s15 + $0x190] ss:$28 sps:$4 sm:$0xff]  }
 0x4bf   : > { %2486 = vmatpush1.bf16.msra.mxu1 %v3536_v13  ;;  %2509 = vmatprep.mubr.bf16.mxu1 %v3712_v3 }
 0x4c0   : > { %2487 = vmatprep.subr.bf16.mxu1 %v3544_v15 }
 0x4c3   : > { %2488 = vmatpush1.bf16.msra.mxu1 %v3542_v17 }
 0x4c4   : > { %2489 = vmatprep.subr.bf16.mxu1 %v3550_v59 }
 0x4c7   : > { %2490 = vmatpush1.bf16.msra.mxu1 %v3548_v60  ;;  %v4348_v60 = vld [vmem:[%s4522_s16] sm:$0x7f] }
 0x4c8   : > { %2491 = vmatprep.subr.bf16.mxu1 %v3556_v63 }
 0x4cb   : > { %2492 = vmatpush1.bf16.msra.mxu1 %v3554_v1 }
 0x4cc   : > { %2623 = vmatprep.subr.bf16.mxu1 %v3562_v4 }
 0x581   : > { %v3386_v19 = vpop.f32.mrb[40].mxu1 }
 0x582   : > { %v1926_v20 = vadd.f32 %v3386_v19, %v3059_v18  ;;  %v1917_v21 = vpop.f32.mrb[41].mxu1  ;;  %v3560_v19 = vld [vmem:[%s4521_s15 + $0x10] ss:$28 sps:$4 sm:$0xff]  }
 0x583   : > { %v1918_v22 = vadd.f32 %v3059_v18, %v1917_v21  ;;  %v3387_v23 = vpop.f32.mrb[42].mxu1  ;;  %v3566_v21 = vld [vmem:[%s4521_s15 + $0x4c] ss:$28 sps:$4 sm:$0xff]  }
 0x584   : > { %v1929_v24 = vadd.f32 %v3387_v23, %v3059_v18  ;;  %v1920_v25 = vpop.f32.mrb[43].mxu1  ;;  %v1950_v27 = vmax.f32 %v1926_v20, 0.0  ;;  %v3564_v23 = vld [vmem:[%s4521_s15 + $0x48] ss:$28 sps:$4 sm:$0xff]  }
 0x585   : > { %v1921_v26 = vadd.f32 %v3059_v18, %v1920_v25  ;;  %v1948_v30 = vmax.f32 %v1918_v22, 0.0  ;;  %v3567_v22 = vld [vmem:[%s4521_s15 + $0x50] ss:$28 sps:$4 sm:$0xff]   ;;  %v3571_v25 = vld [vmem:[%s4521_s15 + $0x88] ss:$28 sps:$4 sm:$0xff]  }
 0x586   : > { %v1951_v28 = vmax.f32 %v1929_v24, 0.0  ;;  %v3570_v24 = vld [vmem:[%s4521_s15 + $0x84] ss:$28 sps:$4 sm:$0xff]  }
 0x587   : > { %v1949_v31 = vmax.f32 %v1921_v26, 0.0  ;;  %v3568_v26 = vld [vmem:[%s4521_s15 + $0x80] ss:$28 sps:$4 sm:$0xff]  }
 0x588   : > { %v1957_v33 = vpack.c.bf16 %v1951_v28, %v1950_v27  ;;  %v3574_v28 = vld [vmem:[%s4521_s15 + $0xbc] ss:$28 sps:$4 sm:$0xff]  }
 0x589   : > { %v1956_v16 = vpack.c.bf16 %v1949_v31, %v1948_v30  ;;  %v3575_v30 = vld [vmem:[%s4521_s15 + $0xc0] ss:$28 sps:$4 sm:$0xff]  }
 0x58b   : > { %3400 = vmatprep.mubr.msk.bf16.mxu0 %vm1554_vm2, %v1956_v16 }
 0x58c   : > { %3401 = vmatmul.mubr.msk.bf16.vlgmr.msra.gmra.mrb[48].mxu0 %vm1554_vm2, %v1957_v33 }
 0x58d   : > { %2551 = vmatpush1.bf16.msra.mxu0 %v3515_v34 }
 0x58e   : > { %2552 = vmatprep.subr.bf16.mxu0 %v3523_v35 }
 0x591   : > { %v3390_v38 = vpop.f32.mrb[44].mxu1  ;;  %2553 = vmatpush1.bf16.msra.mxu0 %v3521_v36 }
 0x592   : > { %v1942_v40 = vadd.f32 %v3390_v38, %v3059_v18  ;;  %v1933_v41 = vpop.f32.mrb[45].mxu1  ;;  %2554 = vmatprep.subr.bf16.mxu0 %v3529_v37  ;;  %v3572_v37 = vld [vmem:[%s4521_s15 + $0xb8] ss:$28 sps:$4 sm:$0xff]  }
 0x593   : > { %v1934_v43 = vadd.f32 %v3059_v18, %v1933_v41  ;;  %v3391_v44 = vpop.f32.mrb[46].mxu1 }
 0x594   : > { %v1945_v29 = vadd.f32 %v3391_v44, %v3059_v18  ;;  %v1936_v46 = vpop.f32.mrb[47].mxu1  ;;  %v1954_v49 = vmax.f32 %v1942_v40, 0.0  ;;  %v3579_v40 = vld [vmem:[%s4521_s15 + $0xf8] ss:$28 sps:$4 sm:$0xff]  }
 0x595   : > { %v1937_v47 = vadd.f32 %v3059_v18, %v1936_v46  ;;  %2555 = vmatpush1.bf16.msra.mxu0 %v3527_v39  ;;  %v1952_v52 = vmax.f32 %v1934_v43, 0.0  ;;  %v3578_v39 = vld [vmem:[%s4521_s15 + $0xf4] ss:$28 sps:$4 sm:$0xff]  }
 0x596   : > { %v1955_v50 = vmax.f32 %v1945_v29, 0.0  ;;  %2556 = vmatprep.subr.bf16.mxu0 %v3535_v42  ;;  %v3576_v46 = vld [vmem:[%s4521_s15 + $0xf0] ss:$28 sps:$4 sm:$0xff]  }
 0x597   : > { %v1953_v53 = vmax.f32 %v1937_v47, 0.0 }
 0x598   : > { %v1959_v54 = vpack.c.bf16 %v1955_v50, %v1954_v49  ;;  %v3583_v49 = vld [vmem:[%s4521_s15 + $0x130] ss:$28 sps:$4 sm:$0xff]   ;;  %v3580_v50 = vld [vmem:[%s4521_s15 + $0x128] ss:$28 sps:$4 sm:$0xff]  }
 0x599   : > { %v1958_v55 = vpack.c.bf16 %v1953_v53, %v1952_v52  ;;  %2557 = vmatpush1.bf16.msra.mxu0 %v3533_v32  ;;  %v3582_v32 = vld [vmem:[%s4521_s15 + $0x12c] ss:$28 sps:$4 sm:$0xff]   ;;  %v3584_v53 = vld [vmem:[%s4521_s15 + $0x160] ss:$28 sps:$4 sm:$0xff]  }
 0x59a   : > { %2558 = vmatprep.subr.bf16.mxu0 %v3541_v51  ;;  %v3586_v51 = vld [vmem:[%s4521_s15 + $0x164] ss:$28 sps:$4 sm:$0xff]  }
 0x59b   : > { %3404 = vmatprep.mubr.msk.bf16.mxu0 %vm1554_vm2, %v1958_v55  ;;  %v3587_v52 = vld [vmem:[%s4521_s15 + $0x168] ss:$28 sps:$4 sm:$0xff]   ;;  %v3591_v55 = vld [vmem:[%s4521_s15 + $0x1a0] ss:$28 sps:$4 sm:$0xff]  }
 0x59c   : > { %3405 = vmatmul.mubr.msk.bf16.gmra.mrb[52].mxu0 %vm1554_vm2, %v1959_v54  ;;  %v3590_v54 = vld [vmem:[%s4521_s15 + $0x19c] ss:$28 sps:$4 sm:$0xff]  }
 0x59d   : > { %2559 = vmatpush1.bf16.msra.mxu0 %v3539_v56  ;;  %2582 = vmatprep.mubr.bf16.mxu0 %v3712_v3  ;;  %v3588_v56 = vld [vmem:[%s4521_s15 + $0x198] ss:$28 sps:$4 sm:$0xff]  }
 0x59e   : > { %2560 = vmatprep.subr.bf16.mxu0 %v3547_v57  ;;  %v2154_v57 = vlaneseq }
 0x5a1   : > { %2561 = vmatpush1.bf16.msra.mxu0 %v3545_v58  ;;  %v4341_v58 = vshrl.u32 %v2154_v57, 7 }
 0x5a2   : > { %2562 = vmatprep.subr.bf16.mxu0 %v3553_v45 }
 0x5a3   : > { %v2156_v59 = vsub.s32 0, %v4341_v58  ;;  %v2164_v45 = vsub.s32 2, %v4341_v58  ;;  %v2168_v63 = vsub.s32 3, %v4341_v58 }
 0x5a5   : > { %2563 = vmatpush1.bf16.msra.mxu0 %v3551_v62  ;;  %v2160_v62 = vsub.s32 1, %v4341_v58  ;;  %v4356_v1 = vrot.slane %v4348_v60, %v2164_v45 }
 0x5a6   : > { %2564 = vmatprep.subr.bf16.mxu0 %v3559_v48  ;;  %v4353_v48 = vrot.slane %v4348_v60, %v2156_v59 }
 0x5a9   : > { %2565 = vmatpush1.bf16.msra.mxu0 %v3557_v2  ;;  %v4359_v2 = vrot.slane %v4348_v60, %v2160_v62 }
 0x5aa   : > { %3408 = vmatprep.subr.bf16.mxu0 %v3563_v5 }
 0x65f   : > { %v3402_v7 = vpop.f32.mrb[48].mxu0 }
 0x660   : > { %v2054_v8 = vadd.f32 %v3402_v7, %v3065_v6  ;;  %v2045_v9 = vpop.f32.mrb[49].mxu0 }
 0x661   : > { %v2046_v10 = vadd.f32 %v3065_v6, %v2045_v9  ;;  %v3403_v11 = vpop.f32.mrb[50].mxu0 }
 0x662   : > { %v2057_v61 = vadd.f32 %v3403_v11, %v3065_v6  ;;  %v2048_v12 = vpop.f32.mrb[51].mxu0  ;;  %v2078_v14 = vmax.f32 %v2054_v8, 0.0 }
 0x663   : > { %v2049_v0 = vadd.f32 %v3065_v6, %v2048_v12  ;;  %v2076_v15 = vmax.f32 %v2046_v10, 0.0 }
 0x664   : > { %v2079_v13 = vmax.f32 %v2057_v61, 0.0 }
 0x665   : > { %v2077_v17 = vmax.f32 %v2049_v0, 0.0 }
 0x666   : > { %v4253_v18 = vpack.c.bf16 %v2079_v13, %v2078_v14 }
 0x667   : > { %v4258_v20 = vpack.c.bf16 %v2077_v17, %v2076_v15 }
 0x669   : > { %2510 = vmatmul.mubr.bf16.vlgmr.msra.gmra.mrb[48].mxu1 %v4258_v20  ;;  %2583 = vmatmul.mubr.bf16.vlgmr.msra.gmra.mrb[56].mxu0 %v4258_v20 }
 0x66a   : > { %2624 = vmatpush1.bf16.msra.mxu1 %v3560_v19  ;;  %3409 = vmatpush3.bf16.msra.mxu0 %v3563_v5 }
 0x66b   : > { %2625 = vmatprep.subr.bf16.mxu1 %v3566_v21  ;;  %3410 = vmatprep.subr.bf16.mxu0 %v3567_v22 }
 0x66c   : > { %2519 = vmatprep.mubr.bf16.mxu1 %v3712_v3  ;;  %2592 = vmatprep.mubr.bf16.mxu0 %v3712_v3 }
 0x66e   : > { %2626 = vmatpush1.bf16.msra.mxu1 %v3564_v23  ;;  %3411 = vmatpush3.bf16.msra.mxu0 %v3567_v22 }
 0x66f   : > { %v3406_v27 = vpop.f32.mrb[52].mxu0  ;;  %2627 = vmatprep.subr.bf16.mxu1 %v3570_v24  ;;  %3412 = vmatprep.subr.bf16.mxu0 %v3571_v25 }
 0x670   : > { %v2070_v31 = vadd.f32 %v3406_v27, %v3065_v6  ;;  %v2061_v33 = vpop.f32.mrb[53].mxu0 }
 0x671   : > { %v2062_v16 = vadd.f32 %v3065_v6, %v2061_v33  ;;  %v3407_v34 = vpop.f32.mrb[54].mxu0  ;;  %2520 = vmatmul.mubr.bf16.gmra.mrb[52].mxu1 %v4253_v18  ;;  %2593 = vmatmul.mubr.bf16.gmra.mrb[60].mxu0 %v4253_v18 }
 0x672   : > { %v2073_v35 = vadd.f32 %v3407_v34, %v3065_v6  ;;  %v2064_v36 = vpop.f32.mrb[55].mxu0  ;;  %2628 = vmatpush1.bf16.msra.mxu1 %v3568_v26  ;;  %3413 = vmatpush3.bf16.msra.mxu0 %v3571_v25  ;;  %v2082_v41 = vmax.f32 %v2070_v31, 0.0 }
 0x673   : > { %v2065_v38 = vadd.f32 %v3065_v6, %v2064_v36  ;;  %2629 = vmatprep.subr.bf16.mxu1 %v3574_v28  ;;  %3414 = vmatprep.subr.bf16.mxu0 %v3575_v30  ;;  %v2080_v43 = vmax.f32 %v2062_v16, 0.0 }
 0x674   : > { %v2083_v42 = vmax.f32 %v2073_v35, 0.0  ;;  %2529 = vmatprep.mubr.bf16.mxu1 %v3712_v3  ;;  %2602 = vmatprep.mubr.bf16.mxu0 %v3712_v3 }
 0x675   : > { %v2081_v44 = vmax.f32 %v2065_v38, 0.0 }
 0x676   : > { %v2087_v29 = vpack.c.bf16 %v2083_v42, %v2082_v41  ;;  %2630 = vmatpush1.bf16.msra.mxu1 %v3572_v37  ;;  %3415 = vmatpush3.bf16.msra.mxu0 %v3575_v30 }
 0x677   : > { %v2086_v47 = vpack.c.bf16 %v2081_v44, %v2080_v43  ;;  %2631 = vmatprep.subr.bf16.mxu1 %v3578_v39  ;;  %3416 = vmatprep.subr.bf16.mxu0 %v3579_v40 }
 0x679   : > { %2530 = vmatmul.mubr.bf16.gmra.mrb[56].mxu1 %v2086_v47  ;;  %2603 = vmatmul.mubr.bf16.gmra.mrb[64].mxu0 %v2086_v47 }
 0x67a   : > { %2632 = vmatpush1.bf16.msra.mxu1 %v3576_v46  ;;  %3417 = vmatpush3.bf16.msra.mxu0 %v3579_v40 }
 0x67b   : > { %2633 = vmatprep.subr.bf16.mxu1 %v3582_v32  ;;  %3418 = vmatprep.subr.bf16.mxu0 %v3583_v49 }
 0x67c   : > { %2539 = vmatprep.mubr.bf16.mxu1 %v3712_v3  ;;  %2612 = vmatprep.mubr.bf16.mxu0 %v3712_v3 }
 0x67e   : > { %2634 = vmatpush1.bf16.msra.mxu1 %v3580_v50  ;;  %3419 = vmatpush3.bf16.msra.mxu0 %v3583_v49 }
 0x67f   : > { %2635 = vmatprep.subr.bf16.mxu1 %v3586_v51  ;;  %3420 = vmatprep.subr.bf16.mxu0 %v3587_v52 }
 0x681   : > { %2540 = vmatmul.mubr.bf16.gmra.mrb[60].mxu1 %v2087_v29  ;;  %2613 = vmatmul.mubr.bf16.gmra.mrb[68].mxu0 %v2087_v29 }
 0x682   : > { %2636 = vmatpush1.bf16.msra.mxu1 %v3584_v53  ;;  %3421 = vmatpush3.bf16.msra.mxu0 %v3587_v52 }
 0x683   : > { %3424 = vmatprep.mubr.bf16.mxu0 %v4258_v20  ;;  %2637 = vmatprep.subr.bf16.mxu1 %v3590_v54 }
 0x684   : > { %3422 = vmatprep.subr.bf16.mxu0 %v3591_v55  ;;  %2655 = vmatprep.mubr.bf16.mxu1 %v3712_v3 }
 0x686   : > { %2638 = vmatpush1.bf16.msra.mxu1 %v3588_v56  ;;  %3423 = vmatpush3.bf16.msra.mxu0 %v3591_v55 }
 0x689   : > { %2656 = vmatmul.mubr.bf16.vlgmr.msra.gmra.mrb[64].mxu1 %v4258_v20  ;;  %3425 = vmatmul.mubr.bf16.vlgmr.msra.gmra.mrb[72].mxu0 %v4253_v18 }
 0x68a   : > { %3428 = vmatprep.mubr.bf16.mxu0 %v2086_v47  ;;  %2665 = vmatprep.mubr.bf16.mxu1 %v3712_v3 }
 0x691   : > { %2666 = vmatmul.mubr.bf16.gmra.mrb[68].mxu1 %v4253_v18  ;;  %3429 = vmatmul.mubr.bf16.gmra.mrb[76].mxu0 %v2087_v29 }
 0x692   : > { %2675 = vmatprep.mubr.bf16.mxu1 %v3712_v3 }
 0x699   : > { %2676 = vmatmul.mubr.bf16.gmra.mrb[72].mxu1 %v2086_v47 }
 0x69a   : > { %2685 = vmatprep.mubr.bf16.mxu1 %v3712_v3  ;;  %v4362_v3 = vrot.slane %v4348_v60, %v2168_v63 }
 0x6a1   : > { %2686 = vmatmul.mubr.bf16.gmra.mrb[76].mxu1 %v2087_v29 }
 0x73c   : > { %v2511_v4 = vpop.f32.mrb[48].mxu1  ;;  %v2584_v5 = vpop.f32.mrb[56].mxu0 }
 0x73d   : > { %v2512_v6 = vadd.f32 %v2511_v4, %v4353_v48  ;;  %v2585_v7 = vadd.f32 %v2584_v5, %v4356_v1  ;;  %v2513_v8 = vpop.f32.mrb[49].mxu1  ;;  %v2586_v9 = vpop.f32.mrb[57].mxu0 }
 0x73e   : > { %v2514_v10 = vadd.f32 %v2513_v8, %v4359_v2  ;;  %v2587_v11 = vadd.f32 %v2586_v9, %v4362_v3  ;;  %v2515_v61 = vpop.f32.mrb[50].mxu1  ;;  %v2588_v12 = vpop.f32.mrb[58].mxu0  ;;  %v2172_v8 = vsub.s32 4, %v4341_v58 }
 0x73f   : > { %3592 = vtanh.f32 %v2512_v6  ;;  %v2516_v0 = vadd.f32 %v2515_v61, %v4353_v48  ;;  %v2517_v14 = vpop.f32.mrb[51].mxu1  ;;  %v2590_v13 = vpop.f32.mrb[59].mxu0  ;;  %v2589_v15 = vadd.f32 %v2588_v12, %v4356_v1 }
 0x740   : > { %3594 = vtanh.f32 %v2585_v7  ;;  %v2518_v17 = vadd.f32 %v2517_v14, %v4359_v2  ;;  %v2591_v18 = vadd.f32 %v2590_v13, %v4362_v3 }
 0x741   : > { %3596 = vtanh.f32 %v2514_v10 }
 0x742   : > { %3598 = vtanh.f32 %v2587_v11 }
 0x743   : > { %3600 = vtanh.f32 %v2516_v0  ;;  %v2180_v0 = vsub.s32 6, %v4341_v58 }
 0x744   : > { %3602 = vtanh.f32 %v2589_v15  ;;  %v2521_v19 = vpop.f32.mrb[52].mxu1  ;;  %v2594_v20 = vpop.f32.mrb[60].mxu0 }
 0x745   : > { %3604 = vtanh.f32 %v2518_v17  ;;  %v2522_v21 = vadd.f32 %v2521_v19, %v4353_v48  ;;  %v2595_v22 = vadd.f32 %v2594_v20, %v4356_v1  ;;  %v2523_v23 = vpop.f32.mrb[53].mxu1  ;;  %v2596_v24 = vpop.f32.mrb[61].mxu0  ;;  %v2176_v19 = vsub.s32 5, %v4341_v58 }
 0x746   : > { %3606 = vtanh.f32 %v2591_v18  ;;  %v2524_v25 = vadd.f32 %v2523_v23, %v4359_v2  ;;  %v2597_v26 = vadd.f32 %v2596_v24, %v4362_v3  ;;  %v2525_v27 = vpop.f32.mrb[54].mxu1  ;;  %v2598_v28 = vpop.f32.mrb[62].mxu0 }
 0x747   : > { %3608 = vtanh.f32 %v2522_v21  ;;  %v2526_v30 = vadd.f32 %v2525_v27, %v4353_v48  ;;  %v2527_v31 = vpop.f32.mrb[55].mxu1  ;;  %v2600_v33 = vpop.f32.mrb[63].mxu0  ;;  %v2599_v16 = vadd.f32 %v2598_v28, %v4356_v1  ;;  %v4422_v27 = vrot.slane %v4348_v60, %v2172_v8 }
 0x748   : > { %3610 = vtanh.f32 %v2595_v22  ;;  %v2528_v35 = vadd.f32 %v2527_v31, %v4359_v2  ;;  %v2601_v37 = vadd.f32 %v2600_v33, %v4362_v3 }
 0x749   : > { %v3593_v34 = vpop.eup %3592  ;;  %3612 = vtanh.f32 %v2524_v25 }
 0x74a   : > { %v3595_v36 = vpop.eup %3594  ;;  %2817 = vst [vmem:[%s4381_s29] sm:$0xff] %v3593_v34  ;;  %3614 = vtanh.f32 %v2597_v26 }
 0x74b   : > { %v3597_v38 = vpop.eup %3596  ;;  %2819 = vst [vmem:[%s4381_s29 + $0x10] sm:$0xff] %v3595_v36  ;;  %3616 = vtanh.f32 %v2526_v30 }
 0x74c   : > { %v3599_v39 = vpop.eup %3598  ;;  %2818 = vst [vmem:[%s4381_s29 + $0x8] sm:$0xff] %v3597_v38  ;;  %3618 = vtanh.f32 %v2599_v16  ;;  %v2531_v40 = vpop.f32.mrb[56].mxu1 }
 0x74d   : > { %v2604_v41 = vpop.f32.mrb[64].mxu0  ;;  %v3601_v42 = vpop.eup %3600  ;;  %2820 = vst [vmem:[%s4381_s29 + $0x18] sm:$0xff] %v3599_v39  ;;  %3620 = vtanh.f32 %v2528_v35  ;;  %v2532_v43 = vadd.f32 %v2531_v40, %v4353_v48 }
 0x74e   : > { %v2605_v44 = vadd.f32 %v2604_v41, %v4356_v1  ;;  %v2533_v29 = vpop.f32.mrb[57].mxu1  ;;  %v2606_v46 = vpop.f32.mrb[65].mxu0  ;;  %2824 = vst [vmem:[%s4381_s29 + $0x38] sm:$0xff] %v3601_v42  ;;  %3622 = vtanh.f32 %v2601_v37 }
 0x74f   : > { %v3603_v47 = vpop.eup %3602  ;;  %v2534_v32 = vadd.f32 %v2533_v29, %v4359_v2  ;;  %v2607_v49 = vadd.f32 %v2606_v46, %v4362_v3  ;;  %v2535_v50 = vpop.f32.mrb[58].mxu1  ;;  %3624 = vtanh.f32 %v2532_v43 }
 0x750   : > { %v2608_v51 = vpop.f32.mrb[66].mxu0  ;;  %v3605_v52 = vpop.eup %3604  ;;  %2826 = vst [vmem:[%s4381_s29 + $0x48] sm:$0xff] %v3603_v47  ;;  %v2536_v53 = vadd.f32 %v2535_v50, %v4353_v48  ;;  %3626 = vtanh.f32 %v2605_v44 }
 0x751   : > { %v2537_v54 = vpop.f32.mrb[59].mxu1  ;;  %v2610_v55 = vpop.f32.mrb[67].mxu0  ;;  %2825 = vst [vmem:[%s4381_s29 + $0x40] sm:$0xff] %v3605_v52  ;;  %v2609_v57 = vadd.f32 %v2608_v51, %v4356_v1  ;;  %3628 = vtanh.f32 %v2534_v32 }
 0x752   : > { %v3607_v56 = vpop.eup %3606  ;;  %v2538_v45 = vadd.f32 %v2537_v54, %v4359_v2  ;;  %3630 = vtanh.f32 %v2607_v49  ;;  %v2611_v63 = vadd.f32 %v2610_v55, %v4362_v3 }
 0x753   : > { %v3609_v59 = vpop.eup %3608  ;;  %2827 = vst [vmem:[%s4381_s29 + $0x50] sm:$0xff] %v3607_v56  ;;  %3632 = vtanh.f32 %v2536_v53 }
 0x754   : > { %v3611_v62 = vpop.eup %3610  ;;  %2831 = vst [vmem:[%s4381_s29 + $0x70] sm:$0xff] %v3609_v59  ;;  %3634 = vtanh.f32 %v2609_v57  ;;  %v2541_v6 = vpop.f32.mrb[60].mxu1 }
 0x755   : > { %v3613_v4 = vpop.eup %3612  ;;  %2833 = vst [vmem:[%s4381_s29 + $0x80] sm:$0xff] %v3611_v62  ;;  %v2614_v7 = vpop.f32.mrb[68].mxu0  ;;  %3636 = vtanh.f32 %v2538_v45  ;;  %v2542_v10 = vadd.f32 %v2541_v6, %v4353_v48 }
 0x756   : > { %v3615_v5 = vpop.eup %3614  ;;  %2832 = vst [vmem:[%s4381_s29 + $0x78] sm:$0xff] %v3613_v4  ;;  %v2615_v11 = vadd.f32 %v2614_v7, %v4356_v1  ;;  %v2543_v61 = vpop.f32.mrb[61].mxu1  ;;  %3638 = vtanh.f32 %v2611_v63 }
 0x757   : > { %v3617_v9 = vpop.eup %3616  ;;  %2834 = vst [vmem:[%s4381_s29 + $0x88] sm:$0xff] %v3615_v5  ;;  %v2616_v12 = vpop.f32.mrb[69].mxu0  ;;  %v2544_v13 = vadd.f32 %v2543_v61, %v4359_v2  ;;  %3640 = vtanh.f32 %v2542_v10 }
 0x758   : > { %v3619_v14 = vpop.eup %3618  ;;  %2838 = vst [vmem:[%s4381_s29 + $0xa8] sm:$0xff] %v3617_v9  ;;  %v2617_v15 = vadd.f32 %v2616_v12, %v4362_v3  ;;  %v2545_v17 = vpop.f32.mrb[62].mxu1  ;;  %3642 = vtanh.f32 %v2615_v11 }
 0x759   : > { %v2618_v18 = vpop.f32.mrb[70].mxu0  ;;  %v3621_v20 = vpop.eup %3620  ;;  %2840 = vst [vmem:[%s4381_s29 + $0xb8] sm:$0xff] %v3619_v14  ;;  %v2546_v21 = vadd.f32 %v2545_v17, %v4353_v48  ;;  %3644 = vtanh.f32 %v2544_v13  ;;  %v4425_v48 = vrot.slane %v4348_v60, %v2180_v0 }
 0x75a   : > { %v2547_v22 = vpop.f32.mrb[63].mxu1  ;;  %v2620_v23 = vpop.f32.mrb[71].mxu0  ;;  %2839 = vst [vmem:[%s4381_s29 + $0xb0] sm:$0xff] %v3621_v20  ;;  %v2619_v25 = vadd.f32 %v2618_v18, %v4356_v1  ;;  %3646 = vtanh.f32 %v2617_v15  ;;  %v4430_v1 = vrot.slane %v4348_v60, %v2176_v19 }
 0x75b   : > { %v3623_v24 = vpop.eup %3622  ;;  %v2548_v58 = vadd.f32 %v2547_v22, %v4359_v2  ;;  %v2621_v30 = vadd.f32 %v2620_v23, %v4362_v3  ;;  %3648 = vtanh.f32 %v2546_v21 }
 0x75c   : > { %v3625_v26 = vpop.eup %3624  ;;  %2841 = vst [vmem:[%s4381_s29 + $0xc0] sm:$0xff] %v3623_v24  ;;  %3650 = vtanh.f32 %v2619_v25  ;;  %v2657_v33 = vpop.f32.mrb[64].mxu1 }
 0x75d   : > { %v3627_v28 = vpop.eup %3626  ;;  %2845 = vst [vmem:[%s4381_s29 + $0xe0] sm:$0xff] %v3625_v26  ;;  %v3426_v16 = vpop.f32.mrb[72].mxu0  ;;  %3652 = vtanh.f32 %v2548_v58  ;;  %v2658_v35 = vadd.f32 %v2657_v33, %v4422_v27 }
 0x75e   : > { %v3629_v31 = vpop.eup %3628  ;;  %2847 = vst [vmem:[%s4381_s29 + $0xf0] sm:$0xff] %v3627_v28  ;;  %v2739_v3 = vadd.f32 %v3426_v16, %v4425_v48  ;;  %v2659_v36 = vpop.f32.mrb[65].mxu1  ;;  %3654 = vtanh.f32 %v2621_v30 }
 0x75f   : > { %v3631_v2 = vpop.eup %3630  ;;  %2846 = vst [vmem:[%s4381_s29 + $0xe8] sm:$0xff] %v3629_v31  ;;  %v2730_v60 = vpop.f32.mrb[73].mxu0  ;;  %v2660_v38 = vadd.f32 %v2659_v36, %v4430_v1  ;;  %3656 = vtanh.f32 %v2658_v35 }
 0x760   : > { %v3633_v34 = vpop.eup %3632  ;;  %2848 = vst [vmem:[%s4381_s29 + $0xf8] sm:$0xff] %v3631_v2  ;;  %v2731_v39 = vadd.f32 %v2730_v60, %v4425_v48  ;;  %v2661_v40 = vpop.f32.mrb[66].mxu1  ;;  %3658 = vtanh.f32 %v2739_v3 }
 0x761   : > { %v3635_v37 = vpop.eup %3634  ;;  %2852 = vst [vmem:[%s4381_s29 + $0x118] sm:$0xff] %v3633_v34  ;;  %v3427_v41 = vpop.f32.mrb[74].mxu0  ;;  %v2662_v43 = vadd.f32 %v2661_v40, %v4422_v27  ;;  %3660 = vtanh.f32 %v2660_v38 }
 0x762   : > { %v3637_v42 = vpop.eup %3636  ;;  %2854 = vst [vmem:[%s4381_s29 + $0x128] sm:$0xff] %v3635_v37  ;;  %v2663_v44 = vpop.f32.mrb[67].mxu1  ;;  %v2742_v47 = vadd.f32 %v3427_v41, %v4425_v48  ;;  %3662 = vtanh.f32 %v2731_v39 }
 0x763   : > { %v2733_v29 = vpop.f32.mrb[75].mxu0  ;;  %v3639_v46 = vpop.eup %3638  ;;  %2853 = vst [vmem:[%s4381_s29 + $0x120] sm:$0xff] %v3637_v42  ;;  %v2664_v49 = vadd.f32 %v2663_v44, %v4430_v1  ;;  %3664 = vtanh.f32 %v2662_v43 }
 0x764   : > { %v3641_v32 = vpop.eup %3640  ;;  %2855 = vst [vmem:[%s4381_s29 + $0x130] sm:$0xff] %v3639_v46  ;;  %v2734_v51 = vadd.f32 %v2733_v29, %v4425_v48  ;;  %3666 = vtanh.f32 %v2742_v47  ;;  %v2667_v54 = vpop.f32.mrb[68].mxu1 }
 0x765   : > { %v3643_v50 = vpop.eup %3642  ;;  %2859 = vst [vmem:[%s4381_s29 + $0x150] sm:$0xff] %v3641_v32  ;;  %v3430_v55 = vpop.f32.mrb[76].mxu0  ;;  %3668 = vtanh.f32 %v2664_v49  ;;  %v2668_v57 = vadd.f32 %v2667_v54, %v4422_v27 }
 0x766   : > { %v3645_v52 = vpop.eup %3644  ;;  %2861 = vst [vmem:[%s4381_s29 + $0x160] sm:$0xff] %v3643_v50  ;;  %v2755_v59 = vadd.f32 %v3430_v55, %v4425_v48  ;;  %v2669_v45 = vpop.f32.mrb[69].mxu1  ;;  %3670 = vtanh.f32 %v2734_v51 }
 0x767   : > { %v3647_v53 = vpop.eup %3646  ;;  %2860 = vst [vmem:[%s4381_s29 + $0x158] sm:$0xff] %v3645_v52  ;;  %v2746_v62 = vpop.f32.mrb[77].mxu0  ;;  %v2670_v4 = vadd.f32 %v2669_v45, %v4430_v1  ;;  %3672 = vtanh.f32 %v2668_v57 }
 0x768   : > { %v3649_v56 = vpop.eup %3648  ;;  %2862 = vst [vmem:[%s4381_s29 + $0x168] sm:$0xff] %v3647_v53  ;;  %v2747_v5 = vadd.f32 %v2746_v62, %v4425_v48  ;;  %v2671_v6 = vpop.f32.mrb[70].mxu1  ;;  %3674 = vtanh.f32 %v2755_v59 }
 0x769   : > { %v3651_v63 = vpop.eup %3650  ;;  %2866 = vst [vmem:[%s4381_s29 + $0x188] sm:$0xff] %v3649_v56  ;;  %v3431_v7 = vpop.f32.mrb[78].mxu0  ;;  %v2672_v9 = vadd.f32 %v2671_v6, %v4422_v27  ;;  %3676 = vtanh.f32 %v2670_v4 }
 0x76a   : > { %v3653_v8 = vpop.eup %3652  ;;  %2868 = vst [vmem:[%s4381_s29 + $0x198] sm:$0xff] %v3651_v63  ;;  %v2673_v10 = vpop.f32.mrb[71].mxu1  ;;  %v2758_v12 = vadd.f32 %v3431_v7, %v4425_v48  ;;  %3678 = vtanh.f32 %v2747_v5 }
 0x76b   : > { %v2749_v11 = vpop.f32.mrb[79].mxu0  ;;  %v3655_v61 = vpop.eup %3654  ;;  %2867 = vst [vmem:[%s4381_s29 + $0x190] sm:$0xff] %v3653_v8  ;;  %v2674_v14 = vadd.f32 %v2673_v10, %v4430_v1  ;;  %3680 = vtanh.f32 %v2672_v9 }
 0x76c   : > { %v3657_v0 = vpop.eup %3656  ;;  %2869 = vst [vmem:[%s4381_s29 + $0x1a0] sm:$0xff] %v3655_v61  ;;  %v2750_v15 = vadd.f32 %v2749_v11, %v4425_v48  ;;  %3682 = vtanh.f32 %v2758_v12  ;;  %v2677_v19 = vpop.f32.mrb[72].mxu1 }
 0x76d   : > { %v3659_v13 = vpop.eup %3658  ;;  %2821 = vst [vmem:[%s4381_s29 + $0x20] sm:$0xff] %v3657_v0  ;;  %3684 = vtanh.f32 %v2674_v14  ;;  %v2678_v21 = vadd.f32 %v2677_v19, %v4422_v27  ;;  %v2679_v22 = vpop.f32.mrb[73].mxu1 }
 0x76e   : > { %v3661_v17 = vpop.eup %3660  ;;  %2837 = vst.msk [vmem:[%s4381_s29 + $0xa0] sm:$0xff] %vm1082_vm0, %v3659_v13  ;;  %3686 = vtanh.f32 %v2750_v15  ;;  %v2680_v24 = vadd.f32 %v2679_v22, %v4430_v1  ;;  %v2681_v25 = vpop.f32.mrb[74].mxu1 }
 0x76f   : > { %v3663_v18 = vpop.eup %3662  ;;  %2822 = vst [vmem:[%s4381_s29 + $0x28] sm:$0xff] %v3661_v17  ;;  %3688 = vtanh.f32 %v2678_v21  ;;  %v2682_v58 = vadd.f32 %v2681_v25, %v4422_v27  ;;  %v2683_v48 = vpop.f32.mrb[75].mxu1 }
 0x770   : > { %v3665_v20 = vpop.eup %3664  ;;  %2823 = vst.msk [vmem:[%s4381_s29 + $0x30] sm:$0xff] %vm1082_vm0, %v3663_v18  ;;  %3690 = vtanh.f32 %v2680_v24  ;;  %v2684_v30 = vadd.f32 %v2683_v48, %v4430_v1 }
 0x771   : > { %v3667_v23 = vpop.eup %3666  ;;  %2828 = vst [vmem:[%s4381_s29 + $0x58] sm:$0xff] %v3665_v20  ;;  %3692 = vtanh.f32 %v2682_v58 }
 0x772   : > { %v3669_v26 = vpop.eup %3668  ;;  %2844 = vst.msk [vmem:[%s4381_s29 + $0xd8] sm:$0xff] %vm1082_vm0, %v3667_v23  ;;  %3694 = vtanh.f32 %v2684_v30 }
 0x773   : > { %v3671_v28 = vpop.eup %3670  ;;  %2829 = vst [vmem:[%s4381_s29 + $0x60] sm:$0xff] %v3669_v26 }
 0x774   : > { %v3673_v31 = vpop.eup %3672  ;;  %2830 = vst.msk [vmem:[%s4381_s29 + $0x68] sm:$0xff] %vm1082_vm0, %v3671_v28  ;;  %v2687_v34 = vpop.f32.mrb[76].mxu1 }
 0x775   : > { %v3675_v2 = vpop.eup %3674  ;;  %2835 = vst [vmem:[%s4381_s29 + $0x90] sm:$0xff] %v3673_v31  ;;  %v2688_v3 = vadd.f32 %v2687_v34, %v4422_v27  ;;  %v2689_v36 = vpop.f32.mrb[77].mxu1 }
 0x776   : > { %v3677_v33 = vpop.eup %3676  ;;  %2865 = vst.msk [vmem:[%s4381_s29 + $0x180] sm:$0xff] %vm1082_vm0, %v3675_v2  ;;  %v2690_v37 = vadd.f32 %v2689_v36, %v4430_v1  ;;  %v2691_v38 = vpop.f32.mrb[78].mxu1 }
 0x777   : > { %v3679_v16 = vpop.eup %3678  ;;  %2836 = vst [vmem:[%s4381_s29 + $0x98] sm:$0xff] %v3677_v33  ;;  %3696 = vtanh.f32 %v2688_v3  ;;  %v2692_v40 = vadd.f32 %v2691_v38, %v4422_v27  ;;  %v2693_v41 = vpop.f32.mrb[79].mxu1 }
 0x778   : > { %v3681_v35 = vpop.eup %3680  ;;  %2851 = vst.msk [vmem:[%s4381_s29 + $0x110] sm:$0xff] %vm1082_vm0, %v3679_v16  ;;  %3698 = vtanh.f32 %v2690_v37  ;;  %v2694_v43 = vadd.f32 %v2693_v41, %v4430_v1 }
 0x779   : > { %v3683_v60 = vpop.eup %3682  ;;  %2842 = vst [vmem:[%s4381_s29 + $0xc8] sm:$0xff] %v3681_v35  ;;  %3700 = vtanh.f32 %v2692_v40 }
 0x77a   : > { %v3685_v39 = vpop.eup %3684  ;;  %2872 = vst.msk [vmem:[%s4381_s29 + $0x1b8] sm:$0xff] %vm1082_vm0, %v3683_v60  ;;  %3702 = vtanh.f32 %v2694_v43 }
 0x77b   : > { %v3687_v42 = vpop.eup %3686  ;;  %2843 = vst [vmem:[%s4381_s29 + $0xd0] sm:$0xff] %v3685_v39 }
 0x77c   : > { %v3689_v44 = vpop.eup %3688  ;;  %2858 = vst.msk [vmem:[%s4381_s29 + $0x148] sm:$0xff] %vm1082_vm0, %v3687_v42 }
 0x77d   : > { %v3691_v29 = vpop.eup %3690  ;;  %2849 = vst [vmem:[%s4381_s29 + $0x100] sm:$0xff] %v3689_v44 }
 0x77e   : > { %v3693_v46 = vpop.eup %3692  ;;  %2850 = vst [vmem:[%s4381_s29 + $0x108] sm:$0xff] %v3691_v29 }
 0x77f   : > { %v3695_v27 = vpop.eup %3694  ;;  %2856 = vst [vmem:[%s4381_s29 + $0x138] sm:$0xff] %v3693_v46 }
 0x780   : > { %2857 = vst [vmem:[%s4381_s29 + $0x140] sm:$0xff] %v3695_v27 }
 0x781   : > { %v3697_v47 = vpop.eup %3696 }
 0x782   : > { %v3699_v32 = vpop.eup %3698  ;;  %2863 = vst [vmem:[%s4381_s29 + $0x170] sm:$0xff] %v3697_v47 }
 0x783   : > { %v3701_v49 = vpop.eup %3700  ;;  %2864 = vst [vmem:[%s4381_s29 + $0x178] sm:$0xff] %v3699_v32 }
 0x784   : > { %v3703_v1 = vpop.eup %3702  ;;  %2870 = vst [vmem:[%s4381_s29 + $0x1a8] sm:$0xff] %v3701_v49 }
 0x785   : > { %2871 = vst [vmem:[%s4381_s29 + $0x1b0] sm:$0xff] %v3703_v1 }
 0x786 PF: > { %s29_s27 = sadd.s32 1, %s3710_s27  }
 0x787   : > { %p26_p4 = scmp.ge.s32.totalorder %s29_s27, 4  }
 0x789   :  { %28 = sbr.rel (!%p26_p4) target bundleno = 4 (0x4), region = 130 }

</bundles_post_ra>
